<compile_context>
chip_gen: v5e
topology: v5e:2x2
jax: 0.10.0
libtpu: 0.0.40
codegen_flags: <defaults>
</compile_context>

<pallas_src>
import functools

import jax
import jax.numpy as jnp
from jax import lax
from jax.experimental import pallas as pl
from jax.experimental.pallas import tpu as pltpu


def _bottleneck_kernel(x_hbm, w1_ref, w2_ref, w3_ref, b1_ref, b2_ref, b3_ref,
                       o_ref, xbuf, copy_sem,
                       *, H, W, Cin, width, Cout, TH, T):
    # x_hbm: (N, H+2, W, Cin) bf16 in HBM (pre-padded by 1 zero row top/bottom).
    # o_ref block: (1, TH, W, Cout) bf16 (one row tile).
    # xbuf: (2, TH+2, W, Cin) bf16 VMEM double buffer; copy_sem: DMA sems (2,).
    n = pl.program_id(0)
    t = pl.program_id(1)
    slot = t % 2
    row0 = t * TH

    def tile_copy(tt, s):
        # Rows [tt*TH, tt*TH + TH + 2) of the H-padded image = output rows + 1-row halo.
        return pltpu.make_async_copy(
            x_hbm.at[n, pl.ds(tt * TH, TH + 2)], xbuf.at[s], copy_sem.at[s])

    # Prime the pipeline at the first row tile of each image (n is the parallel axis,
    # t is sequential per core, so this core owns every t of this image).
    @pl.when(t == 0)
    def _():
        tile_copy(0, 0).start()

    # Wait for the current tile's halo window.
    tile_copy(t, slot).wait()

    # Prefetch the next row tile of this image under this tile's compute.
    @pl.when(t + 1 < T)
    def _():
        tile_copy(t + 1, 1 - slot).start()

    xt = xbuf[slot]                                           # (TH+2, W, Cin) bf16

    # ---- conv1 (1x1, BN scale pre-folded) + bias + ReLU ----
    x2d = xt.reshape((TH + 2) * W, Cin)
    h1 = jnp.dot(x2d, w1_ref[...], preferred_element_type=jnp.float32)
    h1 = jnp.maximum(h1 + b1_ref[...], 0.0)
    h1b = h1.reshape(TH + 2, W, width).astype(jnp.bfloat16)   # (TH+2, W, width)

    # Halo rows that fall outside the image must be exactly zero (conv2 zero padding);
    # the zero-padded x rows produce relu(b1) there. Only rows 0 / TH+1 can be affected,
    # so scale just those two rows by scalar 0/1 keep-flags (no full-tile iota/select).
    top_keep = (row0 > 0).astype(jnp.bfloat16)
    bot_keep = (row0 + TH < H).astype(jnp.bfloat16)
    top = h1b[0:1] * top_keep                                 # (1, W, width)
    bot = h1b[TH + 1:TH + 2] * bot_keep                       # (1, W, width)
    mid = h1b[1:TH + 1]                                       # (TH, W, width)

    # ---- conv2 (3x3, pad=1, stride=1): fold BOTH ky and kx into one contraction ----
    # r[h, w, ky*width + c] = h1[h + ky, w, c]  (with boundary halo rows zeroed)
    slab0 = jnp.concatenate([top, mid[:TH - 1]], axis=0)      # h1 rows 0 .. TH-1
    slab2 = jnp.concatenate([mid[1:], bot], axis=0)           # h1 rows 2 .. TH+1
    r = jnp.concatenate([slab0, mid, slab2], axis=-1)         # (TH, W, 3*width)

    zcol = jnp.zeros((TH, 1, 3 * width), dtype=r.dtype)
    q = jnp.concatenate([zcol, r, zcol], axis=1)              # (TH, W+2, 3*width)
    # win[h, w, kx*3*width + ky*width + c] = h1[h+ky, w+kx-1, c] (zero outside image)
    win = jnp.concatenate([q[:, 0:W], q[:, 1:W + 1], q[:, 2:W + 2]], axis=-1)

    h2 = jnp.dot(win.reshape(TH * W, 9 * width), w2_ref[...],
                 preferred_element_type=jnp.float32)          # (TH*W, width)
    h2 = jnp.maximum(h2 + b2_ref[...], 0.0).astype(jnp.bfloat16)

    # ---- conv3 (1x1) + bias + residual add + ReLU ----
    h3 = jnp.dot(h2, w3_ref[...], preferred_element_type=jnp.float32)   # (TH*W, Cout)
    identity = xt[1:TH + 1].reshape(TH * W, Cin).astype(jnp.float32)
    out = jnp.maximum(h3 + b3_ref[...] + identity, 0.0)
    o_ref[0] = out.reshape(TH, W, Cout).astype(o_ref.dtype)


def _pick_th(H):
    if H <= 32:
        return H
    for th in (32, 28, 24, 16, 14, 12, 8):
        if H % th == 0:
            return th
    return H   # TODO(synk): large prime H falls back to a single whole-image tile.


def bottleneck_pallas(x_nhwc, w1, w2f, w3, b1, b2, b3):
    """x_nhwc: (N,H,W,Cin) bf16; w1:(Cin,width), w2f:(9*width,width), w3:(width,Cout)
    bf16 with BN scales folded in; b1/b2/b3: (1,C) f32 folded BN biases."""
    N, H, W, Cin = x_nhwc.shape
    width = w1.shape[1]
    Cout = w3.shape[1]
    assert Cin == Cout, "identity path requires in_channels == out_channels * expansion"

    TH = _pick_th(H)          # row-tile height
    T = H // TH

    # Pre-pad along H so every row tile (including the first/last) can fetch its 1-row
    # halo with a plain dynamic-slice DMA.
    x_pad = jnp.pad(x_nhwc, ((0, 0), (1, 1), (0, 0), (0, 0)))

    kernel = functools.partial(_bottleneck_kernel, H=H, W=W, Cin=Cin,
                               width=width, Cout=Cout, TH=TH, T=T)

    return pl.pallas_call(
        kernel,
        out_shape=jax.ShapeDtypeStruct((N, H, W, Cout), jnp.bfloat16),
        grid=(N, T),
        in_specs=[
            pl.BlockSpec(memory_space=pl.ANY),                        # x stays in HBM; manual DMA
            pl.BlockSpec((Cin, width), lambda n, t: (0, 0)),          # w1 (BN scale folded)
            pl.BlockSpec((9 * width, width), lambda n, t: (0, 0)),    # w2 flattened (kx, ky, cin)
            pl.BlockSpec((width, Cout), lambda n, t: (0, 0)),         # w3 (BN scale folded)
            pl.BlockSpec((1, width), lambda n, t: (0, 0)),            # b1
            pl.BlockSpec((1, width), lambda n, t: (0, 0)),            # b2
            pl.BlockSpec((1, Cout), lambda n, t: (0, 0)),             # b3
        ],
        out_specs=pl.BlockSpec((1, TH, W, Cout), lambda n, t: (n, t, 0, 0)),
        scratch_shapes=[
            pltpu.VMEM((2, TH + 2, W, Cin), jnp.bfloat16),            # double-buffered x tile
            pltpu.SemaphoreType.DMA((2,)),
        ],
        compiler_params=pltpu.CompilerParams(
            dimension_semantics=("parallel", "arbitrary"),
            vmem_limit_bytes=32 * 1024 * 1024),
    )(x_pad, w1, w2f, w3, b1, b2, b3)


def _fold_bn(gamma, beta, mean, var, eps=1e-5):
    scale = gamma / jnp.sqrt(var + eps)
    bias = beta - mean * scale
    return scale.astype(jnp.float32), bias.astype(jnp.float32)


def prepare_params(w1_pt, w2_pt, w3_pt, bn1, bn2, bn3, eps=1e-5):
    """PyTorch-layout conv weights (O,I,kH,kW) + BN params -> kernel-ready bf16 weights
    (BN scale folded per output channel) and f32 biases. Also returns folded HWIO w2
    (bf16) for the pure-JAX reference."""
    s1, b1 = _fold_bn(*bn1, eps)
    s2, b2 = _fold_bn(*bn2, eps)
    s3, b3 = _fold_bn(*bn3, eps)

    w1 = jnp.transpose(w1_pt[:, :, 0, 0], (1, 0)) * s1[None, :]              # (Cin, width)
    w2_hwio = jnp.transpose(w2_pt, (2, 3, 1, 0)) * s2[None, None, None, :]   # (ky, kx, cin, cout)
    w3 = jnp.transpose(w3_pt[:, :, 0, 0], (1, 0)) * s3[None, :]              # (width, Cout)

    width = w1.shape[1]
    # Flatten to (kx, ky, cin) x cout so conv2 is a single 9*width-deep matmul.
    w2f = jnp.transpose(w2_hwio, (1, 0, 2, 3)).reshape(9 * width, width)

    bf = jnp.bfloat16
    return (w1.astype(bf), w2f.astype(bf), w3.astype(bf),
            b1.reshape(1, -1), b2.reshape(1, -1), b3.reshape(1, -1),
            w2_hwio.astype(bf))


def _reference(x_nhwc_bf, w1, w2_hwio, w3, b1, b2, b3):
    """Pure-JAX reference (NHWC/HWIO) mimicking the kernel's bf16 rounding points."""
    dn = ('NHWC', 'HWIO', 'NHWC')
    f32 = lambda a: a.astype(jnp.float32)
    bf_round = lambda a: a.astype(jnp.bfloat16).astype(jnp.float32)
    x = f32(x_nhwc_bf)
    Cin, width = w1.shape
    Cout = w3.shape[1]
    h = lax.conv_general_dilated(x, f32(w1).reshape(1, 1, Cin, width), (1, 1), 'VALID',
                                 dimension_numbers=dn)
    h = bf_round(jnp.maximum(h + b1.reshape(1, 1, 1, -1), 0.0))
    h = lax.conv_general_dilated(h, f32(w2_hwio), (1, 1), [(1, 1), (1, 1)],
                                 dimension_numbers=dn)
    h = bf_round(jnp.maximum(h + b2.reshape(1, 1, 1, -1), 0.0))
    h = lax.conv_general_dilated(h, f32(w3).reshape(1, 1, width, Cout), (1, 1), 'VALID',
                                 dimension_numbers=dn)
    h = h + b3.reshape(1, 1, 1, -1)
    return jnp.maximum(h + x, 0.0)


def _bn_params(k, c):
    k1, k2, k3, k4 = jax.random.split(k, 4)
    gamma = 0.5 + jax.random.uniform(k1, (c,), dtype=jnp.float32)
    beta = 0.1 * jax.random.normal(k2, (c,), dtype=jnp.float32)
    mean = 0.1 * jax.random.normal(k3, (c,), dtype=jnp.float32)
    var = 0.5 + jax.random.uniform(k4, (c,), dtype=jnp.float32)
    return gamma, beta, mean, var


def _run_case(key, N, H, W, in_channels, out_channels):
    # ResNetBottleneck(in_channels, out_channels): width = out_channels (base_width=64, groups=1),
    # Cout = out_channels * expansion.
    width = out_channels
    Cout = out_channels * 4
    assert in_channels == Cout

    ks = jax.random.split(key, 7)
    x_nchw = jax.random.normal(ks[0], (N, in_channels, H, W), dtype=jnp.float32)
    w1_pt = 0.1 * jax.random.normal(ks[1], (width, in_channels, 1, 1), dtype=jnp.float32)
    w2_pt = 0.1 * jax.random.normal(ks[2], (width, width, 3, 3), dtype=jnp.float32)
    w3_pt = 0.1 * jax.random.normal(ks[3], (Cout, width, 1, 1), dtype=jnp.float32)
    bn1 = _bn_params(ks[4], width)
    bn2 = _bn_params(ks[5], width)
    bn3 = _bn_params(ks[6], Cout)

    w1, w2f, w3, b1, b2, b3, w2_hwio = prepare_params(w1_pt, w2_pt, w3_pt, bn1, bn2, bn3)

    # NCHW -> NHWC, bf16 activations for the MXU (epilogue stays f32 in-kernel).
    x_nhwc = jnp.transpose(x_nchw, (0, 2, 3, 1)).astype(jnp.bfloat16)

    out = jax.block_until_ready(bottleneck_pallas(x_nhwc, w1, w2f, w3, b1, b2, b3))
    ref = _reference(x_nhwc, w1, w2_hwio, w3, b1, b2, b3)

    assert out.shape == (N, H, W, Cout)
    assert out.dtype == jnp.bfloat16
    assert jnp.allclose(out.astype(jnp.float32), ref, atol=5e-2, rtol=5e-2), \
        "mismatch vs JAX reference"
    # PyTorch-layout output would be: jnp.transpose(out, (0, 3, 1, 2))  # NCHW


if __name__ == "__main__":
    key = jax.random.PRNGKey(0)
    k1, k2 = jax.random.split(key)
    # Primary case: H<=32 -> TH=H, grid=(2, 1); both v7x cores get one image each.
    _run_case(k1, N=2, H=16, W=16, in_channels=128, out_channels=32)
    # Secondary case exercising the double-buffered halo-window DMA pipeline (T=2 row tiles).
    _run_case(k2, N=1, H=48, W=16, in_channels=128, out_channels=32)
    print("KERNEL_OK")
</pallas_src>

<mosaic_0001>
module attributes {stable_mosaic.version = 11 : i64} {
  func.func @_bottleneck_kernel(%arg0: i32, %arg1: i32, %arg2: memref<2x18x16x128xbf16, #tpu.memory_space<any>>, %arg3: memref<128x32xbf16, #tpu.memory_space<vmem>>, %arg4: memref<288x32xbf16, #tpu.memory_space<vmem>>, %arg5: memref<32x128xbf16, #tpu.memory_space<vmem>>, %arg6: memref<1x32xf32, #tpu.memory_space<vmem>>, %arg7: memref<1x32xf32, #tpu.memory_space<vmem>>, %arg8: memref<1x128xf32, #tpu.memory_space<vmem>>, %arg9: memref<1x16x16x128xbf16, #tpu.memory_space<vmem>>, %arg10: memref<2x18x16x128xbf16, #tpu.memory_space<vmem>>, %arg11: memref<2x!tpu.dma_semaphore, #tpu.memory_space<semaphore_mem>>) attributes {dimension_semantics = [#tpu.dimension_semantics<parallel>, #tpu.dimension_semantics<arbitrary>], iteration_bounds = array<i64: 2, 1>, scalar_prefetch = 0 : i64, scratch_operands = 2 : i64, tpu.core_type = #tpu.core_type<tc>, window_params = [{}, {pipeline_mode = #tpu.pipeline_mode<synchronous>, transform_indices = @transform_1, window_bounds = array<i64: 128, 32>}, {pipeline_mode = #tpu.pipeline_mode<synchronous>, transform_indices = @transform_2, window_bounds = array<i64: 288, 32>}, {pipeline_mode = #tpu.pipeline_mode<synchronous>, transform_indices = @transform_3, window_bounds = array<i64: 32, 128>}, {pipeline_mode = #tpu.pipeline_mode<synchronous>, transform_indices = @transform_4, window_bounds = array<i64: 1, 32>}, {pipeline_mode = #tpu.pipeline_mode<synchronous>, transform_indices = @transform_5, window_bounds = array<i64: 1, 32>}, {pipeline_mode = #tpu.pipeline_mode<synchronous>, transform_indices = @transform_6, window_bounds = array<i64: 1, 128>}, {transform_indices = @transform_7, window_bounds = array<i64: 1, 16, 16, 128>}]} {
    %c2_i32 = arith.constant 2 : i32
    %c0_i32 = arith.constant 0 : i32
    %0 = arith.cmpi eq, %c2_i32, %c0_i32 : i32
    %c1_i32 = arith.constant 1 : i32
    %1 = arith.select %0, %c1_i32, %c2_i32 : i32
    %2 = arith.remsi %arg1, %1 : i32
    %c0_i32_0 = arith.constant 0 : i32
    %3 = arith.cmpi ne, %2, %c0_i32_0 : i32
    %c0_i32_1 = arith.constant 0 : i32
    %4 = arith.cmpi slt, %2, %c0_i32_1 : i32
    %c0_i32_2 = arith.constant 0 : i32
    %5 = arith.cmpi slt, %1, %c0_i32_2 : i32
    %6 = arith.xori %4, %5 : i1
    %7 = arith.andi %6, %3 : i1
    %8 = arith.addi %2, %1 : i32
    %9 = arith.select %7, %8, %2 : i32
    %c16_i32 = arith.constant 16 : i32
    %10 = arith.muli %arg1, %c16_i32 : i32
    %c0_i32_3 = arith.constant 0 : i32
    %11 = arith.cmpi eq, %arg1, %c0_i32_3 : i32
    %12 = arith.extui %11 : i1 to i32
    %c0_i32_4 = arith.constant 0 : i32
    %13 = arith.cmpi ne, %12, %c0_i32_4 : i32
    scf.if %13 {
      %c0_i32_41 = arith.constant 0 : i32
      %c0_i32_42 = arith.constant 0 : i32
      %c0_i32_43 = arith.constant 0 : i32
      %c0_i32_44 = arith.constant 0 : i32
      %c0_i32_45 = arith.constant 0 : i32
      %90 = tpu.memref_slice %arg2[%arg0, %c0_i32_43, %c0_i32_44, %c0_i32_45] : memref<2x18x16x128xbf16, #tpu.memory_space<any>> -> memref<1x18x16x128xbf16, #tpu.memory_space<any>>
      %91 = tpu.memref_squeeze %90 : memref<1x18x16x128xbf16, #tpu.memory_space<any>> -> memref<18x16x128xbf16, #tpu.memory_space<any>>
      %c0_i32_46 = arith.constant 0 : i32
      %c0_i32_47 = arith.constant 0 : i32
      %c0_i32_48 = arith.constant 0 : i32
      %92 = tpu.memref_slice %arg10[%c0_i32_41, %c0_i32_46, %c0_i32_47, %c0_i32_48] : memref<2x18x16x128xbf16, #tpu.memory_space<vmem>> -> memref<1x18x16x128xbf16, #tpu.memory_space<vmem>>
      %93 = tpu.memref_squeeze %92 : memref<1x18x16x128xbf16, #tpu.memory_space<vmem>> -> memref<18x16x128xbf16, #tpu.memory_space<vmem>>
      %94 = tpu.memref_slice %arg11[%c0_i32_42] : memref<2x!tpu.dma_semaphore, #tpu.memory_space<semaphore_mem>> -> memref<1x!tpu.dma_semaphore, #tpu.memory_space<semaphore_mem>>
      %95 = tpu.memref_squeeze %94 : memref<1x!tpu.dma_semaphore, #tpu.memory_space<semaphore_mem>> -> memref<!tpu.dma_semaphore, #tpu.memory_space<semaphore_mem>>
      tpu.enqueue_dma source(%91 : memref<18x16x128xbf16, #tpu.memory_space<any>>) target(%93 : memref<18x16x128xbf16, #tpu.memory_space<vmem>>) target_semaphore(%95 : memref<!tpu.dma_semaphore, #tpu.memory_space<semaphore_mem>>)
    } else {
    }
    %c16_i32_5 = arith.constant 16 : i32
    %14 = arith.muli %arg1, %c16_i32_5 : i32
    %c0_i32_6 = arith.constant 0 : i32
    %c0_i32_7 = arith.constant 0 : i32
    %15 = tpu.memref_slice %arg2[%arg0, %14, %c0_i32_6, %c0_i32_7] : memref<2x18x16x128xbf16, #tpu.memory_space<any>> -> memref<1x18x16x128xbf16, #tpu.memory_space<any>>
    %16 = tpu.memref_squeeze %15 : memref<1x18x16x128xbf16, #tpu.memory_space<any>> -> memref<18x16x128xbf16, #tpu.memory_space<any>>
    %c0_i32_8 = arith.constant 0 : i32
    %c0_i32_9 = arith.constant 0 : i32
    %c0_i32_10 = arith.constant 0 : i32
    %17 = tpu.memref_slice %arg10[%9, %c0_i32_8, %c0_i32_9, %c0_i32_10] : memref<2x18x16x128xbf16, #tpu.memory_space<vmem>> -> memref<1x18x16x128xbf16, #tpu.memory_space<vmem>>
    %18 = tpu.memref_squeeze %17 : memref<1x18x16x128xbf16, #tpu.memory_space<vmem>> -> memref<18x16x128xbf16, #tpu.memory_space<vmem>>
    %19 = tpu.memref_slice %arg11[%9] : memref<2x!tpu.dma_semaphore, #tpu.memory_space<semaphore_mem>> -> memref<1x!tpu.dma_semaphore, #tpu.memory_space<semaphore_mem>>
    %20 = tpu.memref_squeeze %19 : memref<1x!tpu.dma_semaphore, #tpu.memory_space<semaphore_mem>> -> memref<!tpu.dma_semaphore, #tpu.memory_space<semaphore_mem>>
    tpu.wait_dma2 semaphore(%20 : memref<!tpu.dma_semaphore, #tpu.memory_space<semaphore_mem>>) src(%16 : memref<18x16x128xbf16, #tpu.memory_space<any>>) dst(%18 : memref<18x16x128xbf16, #tpu.memory_space<vmem>>)
    %c1_i32_11 = arith.constant 1 : i32
    %21 = arith.addi %arg1, %c1_i32_11 : i32
    %c1_i32_12 = arith.constant 1 : i32
    %22 = arith.cmpi slt, %21, %c1_i32_12 : i32
    %23 = arith.extui %22 : i1 to i32
    %c0_i32_13 = arith.constant 0 : i32
    %24 = arith.cmpi ne, %23, %c0_i32_13 : i32
    scf.if %24 {
      %c1_i32_41 = arith.constant 1 : i32
      %90 = arith.addi %arg1, %c1_i32_41 : i32
      %c1_i32_42 = arith.constant 1 : i32
      %91 = arith.subi %c1_i32_42, %9 : i32
      %c16_i32_43 = arith.constant 16 : i32
      %92 = arith.muli %90, %c16_i32_43 : i32
      %c0_i32_44 = arith.constant 0 : i32
      %c0_i32_45 = arith.constant 0 : i32
      %93 = tpu.memref_slice %arg2[%arg0, %92, %c0_i32_44, %c0_i32_45] : memref<2x18x16x128xbf16, #tpu.memory_space<any>> -> memref<1x18x16x128xbf16, #tpu.memory_space<any>>
      %94 = tpu.memref_squeeze %93 : memref<1x18x16x128xbf16, #tpu.memory_space<any>> -> memref<18x16x128xbf16, #tpu.memory_space<any>>
      %c0_i32_46 = arith.constant 0 : i32
      %c0_i32_47 = arith.constant 0 : i32
      %c0_i32_48 = arith.constant 0 : i32
      %95 = tpu.memref_slice %arg10[%91, %c0_i32_46, %c0_i32_47, %c0_i32_48] : memref<2x18x16x128xbf16, #tpu.memory_space<vmem>> -> memref<1x18x16x128xbf16, #tpu.memory_space<vmem>>
      %96 = tpu.memref_squeeze %95 : memref<1x18x16x128xbf16, #tpu.memory_space<vmem>> -> memref<18x16x128xbf16, #tpu.memory_space<vmem>>
      %97 = tpu.memref_slice %arg11[%91] : memref<2x!tpu.dma_semaphore, #tpu.memory_space<semaphore_mem>> -> memref<1x!tpu.dma_semaphore, #tpu.memory_space<semaphore_mem>>
      %98 = tpu.memref_squeeze %97 : memref<1x!tpu.dma_semaphore, #tpu.memory_space<semaphore_mem>> -> memref<!tpu.dma_semaphore, #tpu.memory_space<semaphore_mem>>
      tpu.enqueue_dma source(%94 : memref<18x16x128xbf16, #tpu.memory_space<any>>) target(%96 : memref<18x16x128xbf16, #tpu.memory_space<vmem>>) target_semaphore(%98 : memref<!tpu.dma_semaphore, #tpu.memory_space<semaphore_mem>>)
    } else {
    }
    %25 = arith.index_cast %9 : i32 to index
    %c0 = arith.constant 0 : index
    %c0_14 = arith.constant 0 : index
    %c0_15 = arith.constant 0 : index
    %26 = vector.load %arg10[%25, %c0, %c0_14, %c0_15] : memref<2x18x16x128xbf16, #tpu.memory_space<vmem>>, vector<1x18x16x128xbf16>
    %27 = vector.shape_cast %26 : vector<1x18x16x128xbf16> to vector<18x16x128xbf16>
    %28 = vector.shape_cast %27 : vector<18x16x128xbf16> to vector<288x128xbf16>
    %c0_16 = arith.constant 0 : index
    %c0_17 = arith.constant 0 : index
    %29 = vector.load %arg3[%c0_16, %c0_17] : memref<128x32xbf16, #tpu.memory_space<vmem>>, vector<128x32xbf16>
    %cst = arith.constant dense<0.000000e+00> : vector<288x32xf32>
    %30 = tpu.matmul %28, %29, %cst {dimension_numbers = #tpu.dot_dimension_numbers<[1], [0], [0], [1], [0, 0, 1, 1], [], []>} : vector<288x128xbf16>, vector<128x32xbf16>, vector<288x32xf32> -> vector<288x32xf32>
    %c0_18 = arith.constant 0 : index
    %c0_19 = arith.constant 0 : index
    %31 = vector.load %arg6[%c0_18, %c0_19] : memref<1x32xf32, #tpu.memory_space<vmem>>, vector<1x32xf32>
    %32 = vector.broadcast %31 : vector<1x32xf32> to vector<288x32xf32>
    %33 = arith.addf %30, %32 : vector<288x32xf32>
    %cst_20 = arith.constant 0.000000e+00 : f32
    %34 = vector.broadcast %cst_20 : f32 to vector<288x32xf32>
    %35 = arith.maximumf %33, %34 : vector<288x32xf32>
    %36 = vector.shape_cast %35 : vector<288x32xf32> to vector<18x16x32xf32>
    %37 = arith.truncf %36 : vector<18x16x32xf32> to vector<18x16x32xbf16>
    %c0_i32_21 = arith.constant 0 : i32
    %38 = arith.cmpi sgt, %10, %c0_i32_21 : i32
    %39 = arith.extui %38 : i1 to i32
    %40 = arith.sitofp %39 : i32 to f32
    %41 = arith.truncf %40 : f32 to bf16
    %c16_i32_22 = arith.constant 16 : i32
    %42 = arith.addi %10, %c16_i32_22 : i32
    %c16_i32_23 = arith.constant 16 : i32
    %43 = arith.cmpi slt, %42, %c16_i32_23 : i32
    %44 = arith.extui %43 : i1 to i32
    %45 = arith.sitofp %44 : i32 to f32
    %46 = arith.truncf %45 : f32 to bf16
    %47 = vector.extract_strided_slice %37 {offsets = [0, 0, 0], sizes = [1, 16, 32], strides = [1, 1, 1]} : vector<18x16x32xbf16> to vector<1x16x32xbf16>
    %48 = vector.broadcast %41 : bf16 to vector<1x16x32xbf16>
    %49 = arith.mulf %47, %48 : vector<1x16x32xbf16>
    %50 = vector.extract_strided_slice %37 {offsets = [17, 0, 0], sizes = [1, 16, 32], strides = [1, 1, 1]} : vector<18x16x32xbf16> to vector<1x16x32xbf16>
    %51 = vector.broadcast %46 : bf16 to vector<1x16x32xbf16>
    %52 = arith.mulf %50, %51 : vector<1x16x32xbf16>
    %53 = vector.extract_strided_slice %37 {offsets = [1, 0, 0], sizes = [16, 16, 32], strides = [1, 1, 1]} : vector<18x16x32xbf16> to vector<16x16x32xbf16>
    %54 = vector.extract_strided_slice %53 {offsets = [0, 0, 0], sizes = [15, 16, 32], strides = [1, 1, 1]} : vector<16x16x32xbf16> to vector<15x16x32xbf16>
    %55 = tpu.concatenate %49, %54 in 0 : vector<1x16x32xbf16>, vector<15x16x32xbf16> -> vector<16x16x32xbf16>
    %56 = vector.extract_strided_slice %53 {offsets = [1, 0, 0], sizes = [15, 16, 32], strides = [1, 1, 1]} : vector<16x16x32xbf16> to vector<15x16x32xbf16>
    %57 = tpu.concatenate %56, %52 in 0 : vector<15x16x32xbf16>, vector<1x16x32xbf16> -> vector<16x16x32xbf16>
    %58 = tpu.concatenate %55, %53, %57 in 2 : vector<16x16x32xbf16>, vector<16x16x32xbf16>, vector<16x16x32xbf16> -> vector<16x16x96xbf16>
    %cst_24 = arith.constant 0.000000e+00 : bf16
    %59 = vector.broadcast %cst_24 : bf16 to vector<16x1x96xbf16>
    %60 = tpu.concatenate %59, %58, %59 in 1 : vector<16x1x96xbf16>, vector<16x16x96xbf16>, vector<16x1x96xbf16> -> vector<16x18x96xbf16>
    %61 = vector.extract_strided_slice %60 {offsets = [0, 0, 0], sizes = [16, 16, 96], strides = [1, 1, 1]} : vector<16x18x96xbf16> to vector<16x16x96xbf16>
    %62 = vector.extract_strided_slice %60 {offsets = [0, 1, 0], sizes = [16, 16, 96], strides = [1, 1, 1]} : vector<16x18x96xbf16> to vector<16x16x96xbf16>
    %63 = vector.extract_strided_slice %60 {offsets = [0, 2, 0], sizes = [16, 16, 96], strides = [1, 1, 1]} : vector<16x18x96xbf16> to vector<16x16x96xbf16>
    %64 = tpu.concatenate %61, %62, %63 in 2 : vector<16x16x96xbf16>, vector<16x16x96xbf16>, vector<16x16x96xbf16> -> vector<16x16x288xbf16>
    %65 = vector.shape_cast %64 : vector<16x16x288xbf16> to vector<256x288xbf16>
    %c0_25 = arith.constant 0 : index
    %c0_26 = arith.constant 0 : index
    %66 = vector.load %arg4[%c0_25, %c0_26] : memref<288x32xbf16, #tpu.memory_space<vmem>>, vector<288x32xbf16>
    %cst_27 = arith.constant dense<0.000000e+00> : vector<256x32xf32>
    %67 = tpu.matmul %65, %66, %cst_27 {dimension_numbers = #tpu.dot_dimension_numbers<[1], [0], [0], [1], [0, 0, 1, 1], [], []>} : vector<256x288xbf16>, vector<288x32xbf16>, vector<256x32xf32> -> vector<256x32xf32>
    %c0_28 = arith.constant 0 : index
    %c0_29 = arith.constant 0 : index
    %68 = vector.load %arg7[%c0_28, %c0_29] : memref<1x32xf32, #tpu.memory_space<vmem>>, vector<1x32xf32>
    %69 = vector.broadcast %68 : vector<1x32xf32> to vector<256x32xf32>
    %70 = arith.addf %67, %69 : vector<256x32xf32>
    %cst_30 = arith.constant 0.000000e+00 : f32
    %71 = vector.broadcast %cst_30 : f32 to vector<256x32xf32>
    %72 = arith.maximumf %70, %71 : vector<256x32xf32>
    %73 = arith.truncf %72 : vector<256x32xf32> to vector<256x32xbf16>
    %c0_31 = arith.constant 0 : index
    %c0_32 = arith.constant 0 : index
    %74 = vector.load %arg5[%c0_31, %c0_32] : memref<32x128xbf16, #tpu.memory_space<vmem>>, vector<32x128xbf16>
    %cst_33 = arith.constant dense<0.000000e+00> : vector<256x128xf32>
    %75 = tpu.matmul %73, %74, %cst_33 {dimension_numbers = #tpu.dot_dimension_numbers<[1], [0], [0], [1], [0, 0, 1, 1], [], []>} : vector<256x32xbf16>, vector<32x128xbf16>, vector<256x128xf32> -> vector<256x128xf32>
    %76 = vector.extract_strided_slice %27 {offsets = [1, 0, 0], sizes = [16, 16, 128], strides = [1, 1, 1]} : vector<18x16x128xbf16> to vector<16x16x128xbf16>
    %77 = vector.shape_cast %76 : vector<16x16x128xbf16> to vector<256x128xbf16>
    %78 = arith.extf %77 : vector<256x128xbf16> to vector<256x128xf32>
    %c0_34 = arith.constant 0 : index
    %c0_35 = arith.constant 0 : index
    %79 = vector.load %arg8[%c0_34, %c0_35] : memref<1x128xf32, #tpu.memory_space<vmem>>, vector<1x128xf32>
    %80 = vector.broadcast %79 : vector<1x128xf32> to vector<256x128xf32>
    %81 = arith.addf %75, %80 : vector<256x128xf32>
    %82 = arith.addf %81, %78 : vector<256x128xf32>
    %cst_36 = arith.constant 0.000000e+00 : f32
    %83 = vector.broadcast %cst_36 : f32 to vector<256x128xf32>
    %84 = arith.maximumf %82, %83 : vector<256x128xf32>
    %85 = vector.shape_cast %84 : vector<256x128xf32> to vector<16x16x128xf32>
    %86 = arith.truncf %85 : vector<16x16x128xf32> to vector<16x16x128xbf16>
    %c0_37 = arith.constant 0 : index
    %c0_38 = arith.constant 0 : index
    %c0_39 = arith.constant 0 : index
    %c0_40 = arith.constant 0 : index
    %87 = vector.load %arg9[%c0_37, %c0_38, %c0_39, %c0_40] : memref<1x16x16x128xbf16, #tpu.memory_space<vmem>>, vector<1x16x16x128xbf16>
    %88 = vector.shape_cast %87 : vector<1x16x16x128xbf16> to vector<16x16x128xbf16>
    %89 = vector.shape_cast %86 : vector<16x16x128xbf16> to vector<1x16x16x128xbf16>
    tpu.vector_store %arg9[%c0_37, %c0_38, %c0_39, %c0_40], %89 {strides = array<i32>} : memref<1x16x16x128xbf16, #tpu.memory_space<vmem>>, vector<1x16x16x128xbf16>,
    return
  }
  func.func @transform_1(%arg0: i32, %arg1: i32) -> (i32, i32) {
    %c0_i32 = arith.constant 0 : i32
    %c0_i32_0 = arith.constant 0 : i32
    %c0_i32_1 = arith.constant 0 : i32
    return %c0_i32, %c0_i32_0 : i32, i32
  }
  func.func @transform_2(%arg0: i32, %arg1: i32) -> (i32, i32) {
    %c0_i32 = arith.constant 0 : i32
    %c0_i32_0 = arith.constant 0 : i32
    %c0_i32_1 = arith.constant 0 : i32
    return %c0_i32, %c0_i32_0 : i32, i32
  }
  func.func @transform_3(%arg0: i32, %arg1: i32) -> (i32, i32) {
    %c0_i32 = arith.constant 0 : i32
    %c0_i32_0 = arith.constant 0 : i32
    %c0_i32_1 = arith.constant 0 : i32
    return %c0_i32, %c0_i32_0 : i32, i32
  }
  func.func @transform_4(%arg0: i32, %arg1: i32) -> (i32, i32) {
    %c0_i32 = arith.constant 0 : i32
    %c0_i32_0 = arith.constant 0 : i32
    %c0_i32_1 = arith.constant 0 : i32
    return %c0_i32, %c0_i32_0 : i32, i32
  }
  func.func @transform_5(%arg0: i32, %arg1: i32) -> (i32, i32) {
    %c0_i32 = arith.constant 0 : i32
    %c0_i32_0 = arith.constant 0 : i32
    %c0_i32_1 = arith.constant 0 : i32
    return %c0_i32, %c0_i32_0 : i32, i32
  }
  func.func @transform_6(%arg0: i32, %arg1: i32) -> (i32, i32) {
    %c0_i32 = arith.constant 0 : i32
    %c0_i32_0 = arith.constant 0 : i32
    %c0_i32_1 = arith.constant 0 : i32
    return %c0_i32, %c0_i32_0 : i32, i32
  }
  func.func @transform_7(%arg0: i32, %arg1: i32) -> (i32, i32, i32, i32) {
    %c0_i32 = arith.constant 0 : i32
    %c0_i32_0 = arith.constant 0 : i32
    %c0_i32_1 = arith.constant 0 : i32
    return %arg0, %arg1, %c0_i32, %c0_i32_0 : i32, i32, i32, i32
  }
}

</mosaic_0001>

<bundles_post_ra>
// kernel: tpu_custom_call.1
= control target key start
LH: loop header
LB: loop body
LE: loop exit
PB: predicated region body
PF: predicated region fallthrough
CT: control target
= control target key end

     0   :  { %12 = vsyncpa [#allocation5], 0  ;;  %s4148_s0 = inlined_call_operand.hbm [shape: bf16[2,18,16,128], index: 0, kind: input, shape index: {}]   ;;  %s4149_s1 = inlined_call_operand.vmem [shape: bf16[128,32], index: 1, kind: input, shape index: {}]   ;;  %s4150_s2 = inlined_call_operand.vmem [shape: bf16[288,32], index: 2, kind: input, shape index: {}]   ;;  %s4151_s3 = inlined_call_operand.vmem [shape: bf16[32,128], index: 3, kind: input, shape index: {}]   ;;  %s4152_s4 = inlined_call_operand.vmem [shape: f32[1,32], index: 4, kind: input, shape index: {}]   ;;  %s4153_s5 = inlined_call_operand.vmem [shape: f32[1,32], index: 5, kind: input, shape index: {}]   ;;  %s4154_s6 = inlined_call_operand.vmem [shape: f32[1,128], index: 6, kind: input, shape index: {}]   ;;  %s4155_s7 = inlined_call_operand.hbm [shape: bf16[2,16,16,128], index: 7, kind: output, shape index: {}]  }
   0x1   :  { %14 = vsyncpa [#allocation5 + $0x1], 0  ;;  %s3102_s24 = smov 0   ;;  %s3104_s25 = smov 0  }
   0x2   :  { %s3106_s26 = smov 0   ;;  %s3108_s27 = smov 0  }
   0x3   :  { %s3110_s28 = smov 0   ;;  %s3112_s29 = smov 0  }
   0x4 LB: > { %4158 = sst [smem:[#allocation14_spill]] %s3050_s28  ;;  %s2503_s30 = sadd.s32 4294967295, %s3054_s29   ;;  %s3054_s29 = sphi %s3112_s29, %s20_s29   ;;  %s3050_s28 = sphi %s3110_s28, %s4167_s28   ;;  %s3046_s27 = sphi %s3108_s27, %s4166_s27   ;;  %s3042_s26 = sphi %s3106_s26, %s4170_s26   ;;  %s3038_s25 = sphi %s3104_s25, %s4169_s25   ;;  %s3034_s24 = sphi %s3102_s24, %s4168_s24  }
   0x5   : > { %s2504_s8 = sadd.s32 4294967294, %s3054_s29   ;;  %s32_s9 = sadd.s32 1, %s3050_s28 }
   0x6   : > { %s167_s10 = sadd.s32 1, %s3042_s26  ;;  %p34_p0 = scmp.ge.s32.totalorder %s32_s9, 2 }
   0x7   : > { %p177_p1 = scmp.ne.s32.totalorder %s3042_s26, %s3038_s25  ;;  %p178_p2 = scmp.eq.s32.totalorder %s2503_s30, 1 }
   0x8   : > { %p183_p3 = scmp.ne.s32.totalorder %s3038_s25, %s3034_s24  ;;  %s4172_s9 = smov (%p34_p0, %s32_s9), 0 }
   0x9   : > { %4159 = sst [smem:[#allocation15_spill]] %s4172_s9  ;;  %p3142_p4 = por %p178_p2, %p177_p1 }
   0xa   : > { %p184_p5 = scmp.eq.s32.totalorder %s2504_s8, 1  ;;  %s162_s12 = ssub.s32 %s3050_s28, %s4172_s9 }
   0xb   : > { %p2506_p6 = scmp.ge.s32.totalorder %s3054_s29, 1  ;;  %p165_p7 = scmp.eq.s32.totalorder %s162_s12, 0 }
   0xc   : > { %p3149_p8 = por %p184_p5, %p183_p3  ;;  %p220_p9 = scmp.lt.s32.totalorder %s3054_s29, 3 }
   0xd   : > { %s3155_s14 = scalar_select %p165_p7, %s3042_s26, %s167_s10  }
   0xe   : > { %p221_p10 = pnand %p2506_p6, %p220_p9 }
   0xf   : > { %4162 = sst [smem:[#allocation16_spill]] %s3155_s14  ;;  %s242_s15 = sand.u32 (!%p221_p10), 1, %s3038_s25  }
  0x10   : > { %224 = sbr.rel (%p221_p10) target bundleno = 1289 (0x509), region = 44  ;;  %s2507_s17 = sshll.u32 (!%p221_p10), %s242_s15, 7 }
  0x11   : > { %s2733_s16 = smul.u32 (!%p221_p10), 144, %s3046_s27  ;;  %s3056_s22 = smov (!%p221_p10), [#allocation2]  }
  0x12   : > { %s276_s23 = sshll.u32 (!%p221_p10), %s3056_s22, 4  ;;  %s2954_s9 = scalar_lea.hbm (!%p221_p10), %s4148_s0, 288  ;;  %s277_s23 = int_to_ptr.vmem [resolvable:$true] %s276_s23 }
  0x13   : > { %s266_s20 = scalar_lea.hbm (!%p221_p10), %s4148_s0, %s2733_s16 }
  0x14   : > { %s274_s21 = sshll.u32 (!%p221_p10), %s266_s20, 4  ;;  %s275_s21 = int_to_ptr.hbm [resolvable:$true] %s274_s21 }
  0x15   : > { %s2950_s30 = sshra.s32 %s275_s21, 4  ;;  %s2951_s30 = int_to_ptr.hbm [resolvable:$true] %s2950_s30 }
  0x16   : > { %s2952_s8 = scalar_lea.hbm %s2951_s30, 144  ;;  %p2955_p12 = scmp.lt.s32.totalorder %s2951_s30, %s4148_s0 }
  0x17   : > { %p2953_p11 = scmp.ne.s32.totalorder %s2951_s30, %s2952_s8  ;;  %p2956_p13 = scmp.lt.s32.totalorder %s2954_s9, %s2952_s8 }
  0x19   : > { %p2957_p0 = por %p2956_p13, %p2955_p12 }
  0x1b   : > { %p2958_p1 = pnand %p2957_p0, %p2953_p11 }
  0x1d   : > { %2961 = shalt.err (!%p2958_p1)  }
  0x1e   : > { %279 = dma.hbm_to_vmem [thread:$0]  %s275_s21, 2304, %s277_s23, [#allocation3] }
  0x1f   : > { %s3170_s16 = scalar_lea.vmem [#allocation4], %s2507_s17 }
  0x20   : > { %3026 = dma.done.wait [#allocation3], 2304 }
  0x21   : > { %3027 = vsyncadd [#allocation3], 4294964992  ;;  %v2759_v0 = vld [vmem:[%s4149_s1 + $0x38] sm:$0xff]  ;;  %v2758_v1 = vld [vmem:[%s4149_s1 + $0x30] sm:$0xff]  ;;  %v3057_v24 = vmov 0.0   ;;  %s3058_s28 = smov 32  }
  0x22   : > { %530 = vmatpush.bf16.msra.mxu0 %v2759_v0  ;;  %v2757_v2 = vld [vmem:[%s4149_s1 + $0x28] sm:$0xff]  ;;  %v2756_v3 = vld [vmem:[%s4149_s1 + $0x20] sm:$0xff]  ;;  %v2755_v4 = vld [vmem:[%s4149_s1 + $0x18] sm:$0xff]  ;;  %v3202_v25 = vunpack.c.l.bf16 %v3057_v24  ;;  %s3059_s9 = smov 64   ;;  %vm904_vm0 = vcmask 261120   ;;  %vm953_vm1 = vcmask 523264  }
  0x23   : > { %v2754_v5 = vld [vmem:[%s4149_s1 + $0x10] sm:$0xff]  ;;  %v2753_v6 = vld [vmem:[%s4149_s1 + $0x8] sm:$0xff]  ;;  %v2752_v7 = vld [vmem:[%s4149_s1] sm:$0xff]  ;;  %vm1114_vm2 = vcmask 1040384   ;;  %vm1115_vm3 = vsmask.f32 256 }
  0x24   : > { %v2734_v8 = vld [vmem:[#allocation2] sm:$0xff]  ;;  %v2735_v9 = vld [vmem:[#allocation2 + $0x8] sm:$0xff]  ;;  %v2736_v10 = vld [vmem:[#allocation2 + $0x10] sm:$0xff]  ;;  %vm1149_vm5 = vsmask.f32 7424  ;;  %s3060_s14 = smov 96  }
  0x25   : > { %v2737_v11 = vld [vmem:[#allocation2 + $0x18] sm:$0xff]  ;;  %v2738_v12 = vld [vmem:[#allocation2 + $0x20] sm:$0xff]  ;;  %v2739_v13 = vld [vmem:[#allocation2 + $0x28] sm:$0xff]  ;;  %vm1487_vm6 = vcmask 785408   ;;  %vm1406_vm7 = vcmask 1046528   ;;  %s2412_s20 = sshll.u32 %s3170_s16, 4  ;;  %s2413_s20 = int_to_ptr.vmem [resolvable:$true] %s2412_s20 }
  0x26   : > { %531 = vmatpush.bf16.msra.mxu0 %v2758_v1  ;;  %v2740_v14 = vld [vmem:[#allocation2 + $0x30] sm:$0xff]  ;;  %v2741_v15 = vld [vmem:[#allocation2 + $0x38] sm:$0xff]  ;;  %v3199_v16 = vld [vmem:[%s4152_s4] ss:$0 sm:$0xff]  ;;  %s2994_s8 = scalar_lea.hbm %s4155_s7, 256 }
  0x27   : > { %v2742_v17 = vld [vmem:[#allocation2 + $0x40] sm:$0xff]  ;;  %v2743_v31 = vld [vmem:[#allocation2 + $0x48] sm:$0xff]  ;;  %v2744_v48 = vld [vmem:[#allocation2 + $0x50] sm:$0xff] }
  0x28   : > { %v2745_v60 = vld [vmem:[#allocation2 + $0x58] sm:$0xff]  ;;  %vm3280_vm4 = vmand %vm1114_vm2, %vm1115_vm3 }
  0x2a   : > { %532 = vmatpush.bf16.msra.mxu0 %v2757_v2 }
  0x2e   : > { %533 = vmatpush.bf16.msra.mxu0 %v2756_v3 }
  0x32   : > { %534 = vmatpush.bf16.msra.mxu0 %v2755_v4 }
  0x36   : > { %535 = vmatpush.bf16.msra.mxu0 %v2754_v5 }
  0x3a   : > { %536 = vmatpush.bf16.msra.mxu0 %v2753_v6 }
  0x3e   : > { %537 = vmatpush.bf16.msra.mxu0 %v2752_v7 }
  0x41   : > { %538 = vmatmul.bf16.vlgmr.msra.gmra.mxu0 %v2734_v8  ;;  %v2746_v8 = vld [vmem:[#allocation2 + $0x60] sm:$0xff] }
  0x51   : > { %543 = vmatmul.bf16.gmra.mxu0 %v2735_v9 }
  0x61   : > { %548 = vmatmul.bf16.gmra.mxu0 %v2736_v10 }
  0x71   : > { %553 = vmatmul.bf16.gmra.mxu0 %v2737_v11 }
  0x81   : > { %558 = vmatmul.bf16.gmra.mxu0 %v2738_v12 }
  0x91   : > { %563 = vmatmul.bf16.gmra.mxu0 %v2739_v13 }
  0xa1   : > { %568 = vmatmul.bf16.gmra.mxu0 %v2740_v14 }
  0xb1   : > { %573 = vmatmul.bf16.gmra.mxu0 %v2741_v15 }
  0xbe   : > { %v539_v18 = vpop.f32.mrf.mxu0 }
  0xbf   : > { %v540_v19 = vadd.f32 %v3199_v16, %v539_v18 }
  0xc1   : > { %v629_v20 = vmax.f32 %v540_v19, 0.0  ;;  %578 = vmatmul.bf16.gmra.mxu0 %v2742_v17 }
  0xc3   : > { %v665_v21 = vpack.c.bf16 %v629_v20, %v629_v20 }
  0xc5   : > { %v732_v23 = vunpack.c.l.bf16 %v665_v21  ;;  %v2747_v21 = vld [vmem:[#allocation2 + $0x68] sm:$0xff] }
  0xc6   : > { %v541_v22 = vpop.f32.mrf.mxu0 }
  0xc7   : > { %v542_v26 = vadd.f32 %v3199_v16, %v541_v22  ;;  %v735_v28 = vmul.f32 %v3202_v25, %v732_v23 }
  0xc9   : > { %v630_v27 = vmax.f32 %v542_v26, 0.0  ;;  %v737_v33 = vpack.c.bf16 %v735_v28, %v735_v28 }
  0xcb   : > { %v666_v29 = vpack.c.bf16 %v630_v27, %v630_v27  ;;  %v3208_v37 = vunpack.c.l.b16 %v737_v33 }
  0xcd   : > { %v733_v30 = vunpack.c.l.bf16 %v666_v29 }
  0xce   : > { %v544_v32 = vpop.f32.mrf.mxu0 }
  0xcf   : > { %v736_v34 = vmul.f32 %v3202_v25, %v733_v30  ;;  %v545_v36 = vadd.f32 %v3199_v16, %v544_v32 }
  0xd1   : > { %v738_v35 = vpack.c.bf16 %v736_v34, %v736_v34  ;;  %583 = vmatmul.bf16.gmra.mxu0 %v2743_v31  ;;  %v631_v39 = vmax.f32 %v545_v36, 0.0  ;;  %v2748_v34 = vld [vmem:[#allocation2 + $0x70] sm:$0xff] }
  0xd3   : > { %v3210_v38 = vunpack.c.l.b16 %v738_v35  ;;  %v667_v43 = vpack.c.bf16 %v631_v39, %v631_v39 }
  0xd5   : > { %v814_v40 = vpack.c.b16 %v3210_v38, %v3208_v37  ;;  %v784_v46 = vunpack.c.l.b16 %v667_v43 }
  0xd6   : > { %v546_v41 = vpop.f32.mrf.mxu0 }
  0xd7   : > { %v547_v42 = vadd.f32 %v3199_v16, %v546_v41 }
  0xd9   : > { %v632_v44 = vmax.f32 %v547_v42, 0.0 }
  0xdb   : > { %v668_v45 = vpack.c.bf16 %v632_v44, %v632_v44 }
  0xdd   : > { %v785_v47 = vunpack.c.l.b16 %v668_v45 }
  0xde   : > { %v549_v49 = vpop.f32.mrf.mxu0 }
  0xdf   : > { %v3215_v50 = vpack.c.b16 %v785_v47, %v784_v46  ;;  %v550_v51 = vadd.f32 %v3199_v16, %v549_v49  ;;  %v2749_v49 = vld [vmem:[#allocation2 + $0x78] sm:$0xff] }
  0xe1   : > { %588 = vmatmul.bf16.gmra.mxu0 %v2744_v48  ;;  %835 = vrot.lane.b32.xlu0 %v3215_v50, %s3058_s28  ;;  %v633_v52 = vmax.f32 %v550_v51, 0.0 }
  0xe3   : > { %v669_v55 = vpack.c.bf16 %v633_v52, %v633_v52 }
  0xe5   : > { %v786_v58 = vunpack.c.l.b16 %v669_v55 }
  0xe6   : > { %v551_v53 = vpop.f32.mrf.mxu0 }
  0xe7   : > { %v552_v54 = vadd.f32 %v3199_v16, %v551_v53 }
  0xe9   : > { %v634_v56 = vmax.f32 %v552_v54, 0.0 }
  0xeb   : > { %v670_v57 = vpack.c.bf16 %v634_v56, %v634_v56 }
  0xed   : > { %v787_v59 = vunpack.c.l.b16 %v670_v57 }
  0xee   : > { %v554_v61 = vpop.f32.mrf.mxu0 }
  0xef   : > { %v3221_v62 = vpack.c.b16 %v787_v59, %v786_v58  ;;  %v555_v63 = vadd.f32 %v3199_v16, %v554_v61 }
  0xf1   : > { %593 = vmatmul.bf16.gmra.mxu0 %v2745_v60  ;;  %837 = vrot.lane.b32.xlu1 %v3221_v62, %s3058_s28  ;;  %v635_v0 = vmax.f32 %v555_v63, 0.0  ;;  %v2750_v63 = vld [vmem:[#allocation2 + $0x80] sm:$0xff] }
  0xf2   : > { %872 = vrot.lane.b32.xlu0 %v3221_v62, %s3059_s9 }
  0xf3   : > { %v671_v3 = vpack.c.bf16 %v635_v0, %v635_v0 }
  0xf5   : > { %v788_v6 = vunpack.c.l.b16 %v671_v3 }
  0xf6   : > { %v556_v1 = vpop.f32.mrf.mxu0 }
  0xf7   : > { %v557_v2 = vadd.f32 %v3199_v16, %v556_v1 }
  0xf9   : > { %v636_v4 = vmax.f32 %v557_v2, 0.0 }
  0xfb   : > { %v672_v5 = vpack.c.bf16 %v636_v4, %v636_v4 }
  0xfd   : > { %v789_v7 = vunpack.c.l.b16 %v672_v5 }
  0xfe   : > { %v559_v9 = vpop.f32.mrf.mxu0 }
  0xff   : > { %v3229_v10 = vpack.c.b16 %v789_v7, %v788_v6  ;;  %v560_v11 = vadd.f32 %v3199_v16, %v559_v9 }
 0x101   : > { %598 = vmatmul.bf16.gmra.mxu0 %v2746_v8  ;;  %839 = vrot.lane.b32.xlu2 %v3229_v10, %s3058_s28  ;;  %v637_v12 = vmax.f32 %v560_v11, 0.0 }
 0x102   : > { %874 = vrot.lane.b32.xlu1 %v3229_v10, %s3059_s9 }
 0x103   : > { %v673_v15 = vpack.c.bf16 %v637_v12, %v637_v12  ;;  %v2751_v12 = vld [vmem:[#allocation2 + $0x88] sm:$0xff] }
 0x105   : > { %v790_v19 = vunpack.c.l.b16 %v673_v15 }
 0x106   : > { %v561_v13 = vpop.f32.mrf.mxu0 }
 0x107   : > { %v562_v14 = vadd.f32 %v3199_v16, %v561_v13 }
 0x109   : > { %v638_v17 = vmax.f32 %v562_v14, 0.0 }
 0x10b   : > { %v674_v18 = vpack.c.bf16 %v638_v17, %v638_v17 }
 0x10d   : > { %v791_v20 = vunpack.c.l.b16 %v674_v18 }
 0x10e   : > { %v564_v22 = vpop.f32.mrf.mxu0 }
 0x10f   : > { %v3237_v23 = vpack.c.b16 %v791_v20, %v790_v19  ;;  %v565_v24 = vadd.f32 %v3199_v16, %v564_v22 }
 0x111   : > { %603 = vmatmul.bf16.gmra.mxu0 %v2747_v21  ;;  %876 = vrot.lane.b32.xlu2 %v3237_v23, %s3059_s9  ;;  %v639_v26 = vmax.f32 %v565_v24, 0.0 }
 0x112   : > { %841 = vrot.lane.b32.xlu0 %v3237_v23, %s3058_s28 }
 0x113   : > { %v675_v29 = vpack.c.bf16 %v639_v26, %v639_v26 }
 0x115   : > { %v792_v32 = vunpack.c.l.b16 %v675_v29 }
 0x116   : > { %v566_v27 = vpop.f32.mrf.mxu0 }
 0x117   : > { %v567_v28 = vadd.f32 %v3199_v16, %v566_v27 }
 0x119   : > { %v640_v30 = vmax.f32 %v567_v28, 0.0 }
 0x11b   : > { %v676_v31 = vpack.c.bf16 %v640_v30, %v640_v30 }
 0x11d   : > { %v793_v33 = vunpack.c.l.b16 %v676_v31 }
 0x11e   : > { %v569_v35 = vpop.f32.mrf.mxu0 }
 0x11f   : > { %v3245_v36 = vpack.c.b16 %v793_v33, %v792_v32  ;;  %v570_v39 = vadd.f32 %v3199_v16, %v569_v35 }
 0x121   : > { %608 = vmatmul.bf16.gmra.mxu0 %v2748_v34  ;;  %878 = vrot.lane.b32.xlu1 %v3245_v36, %s3059_s9  ;;  %v641_v41 = vmax.f32 %v570_v39, 0.0 }
 0x122   : > { %843 = vrot.lane.b32.xlu0 %v3245_v36, %s3058_s28 }
 0x123   : > { %v677_v44 = vpack.c.bf16 %v641_v41, %v641_v41 }
 0x125   : > { %v794_v47 = vunpack.c.l.b16 %v677_v44 }
 0x126   : > { %v571_v42 = vpop.f32.mrf.mxu0 }
 0x127   : > { %v572_v43 = vadd.f32 %v3199_v16, %v571_v42 }
 0x129   : > { %v642_v45 = vmax.f32 %v572_v43, 0.0 }
 0x12b   : > { %v678_v46 = vpack.c.bf16 %v642_v45, %v642_v45 }
 0x12d   : > { %v795_v48 = vunpack.c.l.b16 %v678_v46 }
 0x12e   : > { %v574_v51 = vpop.f32.mrf.mxu0 }
 0x12f   : > { %v3253_v52 = vpack.c.b16 %v795_v48, %v794_v47  ;;  %v575_v53 = vadd.f32 %v3199_v16, %v574_v51 }
 0x131   : > { %613 = vmatmul.bf16.gmra.mxu0 %v2749_v49  ;;  %880 = vrot.lane.b32.xlu1 %v3253_v52, %s3059_s9  ;;  %v643_v54 = vmax.f32 %v575_v53, 0.0 }
 0x132   : > { %845 = vrot.lane.b32.xlu0 %v3253_v52, %s3058_s28 }
 0x133   : > { %v679_v57 = vpack.c.bf16 %v643_v54, %v643_v54 }
 0x135   : > { %v796_v60 = vunpack.c.l.b16 %v679_v57 }
 0x136   : > { %v576_v55 = vpop.f32.mrf.mxu0 }
 0x137   : > { %v577_v56 = vadd.f32 %v3199_v16, %v576_v55 }
 0x139   : > { %v644_v58 = vmax.f32 %v577_v56, 0.0 }
 0x13b   : > { %v680_v59 = vpack.c.bf16 %v644_v58, %v644_v58 }
 0x13d   : > { %v797_v61 = vunpack.c.l.b16 %v680_v59 }
 0x13e   : > { %v579_v0 = vpop.f32.mrf.mxu0 }
 0x13f   : > { %v3261_v1 = vpack.c.b16 %v797_v61, %v796_v60  ;;  %v580_v2 = vadd.f32 %v3199_v16, %v579_v0 }
 0x141   : > { %618 = vmatmul.bf16.gmra.mxu0 %v2750_v63  ;;  %882 = vrot.lane.b32.xlu1 %v3261_v1, %s3059_s9  ;;  %v645_v3 = vmax.f32 %v580_v2, 0.0 }
 0x143   : > { %v681_v6 = vpack.c.bf16 %v645_v3, %v645_v3 }
 0x145   : > { %v798_v9 = vunpack.c.l.b16 %v681_v6 }
 0x146   : > { %v581_v4 = vpop.f32.mrf.mxu0 }
 0x147   : > { %v582_v5 = vadd.f32 %v3199_v16, %v581_v4 }
 0x149   : > { %v646_v7 = vmax.f32 %v582_v5, 0.0 }
 0x14b   : > { %v682_v8 = vpack.c.bf16 %v646_v7, %v646_v7 }
 0x14d   : > { %v799_v11 = vunpack.c.l.b16 %v682_v8 }
 0x14e   : > { %v584_v13 = vpop.f32.mrf.mxu0 }
 0x14f   : > { %v3267_v14 = vpack.c.b16 %v799_v11, %v798_v9  ;;  %v585_v15 = vadd.f32 %v3199_v16, %v584_v13 }
 0x151   : > { %623 = vmatmul.bf16.gmra.mxu0 %v2751_v12  ;;  %v647_v17 = vmax.f32 %v585_v15, 0.0 }
 0x153   : > { %v683_v20 = vpack.c.bf16 %v647_v17, %v647_v17  ;;  %v836_v24 = vpop.permute.xlu0 %835 }
 0x154   : > { %v907_v32 = vsel %vm904_vm0, %v814_v40, %v836_v24 }
 0x155   : > { %v800_v26 = vunpack.c.l.b16 %v683_v20 }
 0x156   : > { %v586_v18 = vpop.f32.mrf.mxu0 }
 0x157   : > { %v587_v19 = vadd.f32 %v3199_v16, %v586_v18 }
 0x159   : > { %v648_v21 = vmax.f32 %v587_v19, 0.0 }
 0x15b   : > { %v684_v22 = vpack.c.bf16 %v648_v21, %v648_v21  ;;  %v840_v31 = vpop.permute.xlu2 %839 }
 0x15c   : > { %v913_v49 = vsel %vm904_vm0, %v3221_v62, %v840_v31 }
 0x15d   : > { %v801_v27 = vunpack.c.l.b16 %v684_v22 }
 0x15e   : > { %v589_v28 = vpop.f32.mrf.mxu0 }
 0x15f   : > { %v3271_v29 = vpack.c.b16 %v801_v27, %v800_v26  ;;  %v590_v30 = vadd.f32 %v3199_v16, %v589_v28 }
 0x161   : > { %v649_v34 = vmax.f32 %v590_v30, 0.0 }
 0x163   : > { %v685_v46 = vpack.c.bf16 %v649_v34, %v649_v34  ;;  %v838_v51 = vpop.permute.xlu1 %837 }
 0x164   : > { %v873_v33 = vpop.permute.xlu0 %872  ;;  %v910_v4 = vsel %vm904_vm0, %v3215_v50, %v838_v51 }
 0x165   : > { %v955_v35 = vsel %vm953_vm1, %v907_v32, %v873_v33  ;;  %v802_v54 = vunpack.c.l.b16 %v685_v46 }
 0x166   : > { %v986_v39 = vshrl.u32 %v955_v35, 16  ;;  %v591_v41 = vpop.f32.mrf.mxu0  ;;  %v989_v45 = vshll.u32 %v955_v35, 16 }
 0x167   : > { %v592_v42 = vadd.f32 %v3199_v16, %v591_v41 }
 0x168   : > { %v988_v44 = vrot.slane %v986_v39, 7 }
 0x169   : > { %v650_v37 = vmax.f32 %v592_v42, 0.0 }
 0x16a   : > { %v991_v38 = vor.u32 %v989_v45, %v988_v44  ;;  %v3286_v40 = vsel %vm3280_vm4, %v988_v44, 0 }
 0x16b   : > { %v686_v47 = vpack.c.bf16 %v650_v37, %v650_v37  ;;  %v877_v48 = vpop.permute.xlu2 %876  ;;  %v1158_v57 = vshll.u32 %v3286_v40, 16 }
 0x16c   : > { %v3292_v53 = vsel %vm3280_vm4, 0, %v991_v38  ;;  %v959_v56 = vsel %vm953_vm1, %v913_v49, %v877_v48 }
 0x16d   : > { %v803_v55 = vunpack.c.l.b16 %v686_v47  ;;  %v1153_v59 = vshll.u32 %v3292_v53, 16  ;;  %v998_v61 = vshrl.u32 %v959_v56, 16  ;;  %v1151_v63 = vshrl.u32 %v3292_v53, 16 }
 0x16e   : > { %v594_v58 = vpop.f32.mrf.mxu0  ;;  %v1160_v3 = vrot.slane %v1158_v57, 1  ;;  %v1001_v11 = vshll.u32 %v959_v56, 16 }
 0x16f   : > { %v3297_v60 = vpack.c.b16 %v803_v55, %v802_v54  ;;  %v1155_v62 = vrot.slane %v1153_v59, 1  ;;  %v595_v0 = vadd.f32 %v3199_v16, %v594_v58  ;;  %v1000_v5 = vrot.slane %v998_v61, 7 }
 0x171   : > { %v1156_v2 = vor.u32 %v1155_v62, %v1151_v63  ;;  %v651_v8 = vmax.f32 %v595_v0, 0.0  ;;  %v1003_v17 = vor.u32 %v1001_v11, %v1000_v5  ;;  %v3328_v46 = vsel %vm3280_vm4, %v1000_v5, 0 }
 0x172   : > { %v1182_v47 = vshll.u32 %v3328_v46, 16 }
 0x173   : > { %v1161_v7 = vsel %vm1149_vm5, %v1156_v2, %v1160_v3  ;;  %v687_v20 = vpack.c.bf16 %v651_v8, %v651_v8  ;;  %v3313_v26 = vsel %vm3280_vm4, 0, %v1003_v17 }
 0x174   : > { %v875_v6 = vpop.permute.xlu1 %874  ;;  %1342 = vrot.lane.b32.xlu2 %v1161_v7, %s3060_s14  ;;  %v1177_v39 = vshll.u32 %v3313_v26, 16  ;;  %v1175_v49 = vshrl.u32 %v3313_v26, 16  ;;  %v1184_v58 = vrot.slane %v1182_v47, 1 }
 0x175   : > { %v957_v9 = vsel %vm953_vm1, %v910_v4, %v875_v6  ;;  %v804_v28 = vunpack.c.l.b16 %v687_v20  ;;  %v2767_v4 = vld [vmem:[%s4150_s2 + $0x38] sm:$0xff] }
 0x176   : > { %v992_v12 = vshrl.u32 %v957_v9, 16  ;;  %v596_v13 = vpop.f32.mrf.mxu0  ;;  %v995_v19 = vshll.u32 %v957_v9, 16  ;;  %v1179_v38 = vrot.slane %v1177_v39, 1  ;;  %1764 = vmatpush.bf16.msra.mxu1 %v2767_v4  ;;  %2876 = vmatpush.bf16.msra.mxu2 %v2767_v4  ;;  %v2766_v9 = vld [vmem:[%s4150_s2 + $0x30] sm:$0xff] }
 0x177   : > { %v597_v15 = vadd.f32 %v3199_v16, %v596_v13 }
 0x178   : > { %v994_v18 = vrot.slane %v992_v12, 7  ;;  %v1180_v55 = vor.u32 %v1179_v38, %v1175_v49 }
 0x179   : > { %v652_v50 = vmax.f32 %v597_v15, 0.0 }
 0x17a   : > { %v997_v21 = vor.u32 %v995_v19, %v994_v18  ;;  %v3309_v22 = vsel %vm3280_vm4, %v994_v18, 0  ;;  %v1185_v61 = vsel %vm1149_vm5, %v1180_v55, %v1184_v58  ;;  %1765 = vmatpush.bf16.msra.mxu1 %v2766_v9  ;;  %2877 = vmatpush.bf16.msra.mxu2 %v2766_v9 }
 0x17b   : > { %v688_v24 = vpack.c.bf16 %v652_v50, %v652_v50  ;;  %v1170_v30 = vshll.u32 %v3309_v22, 16 }
 0x17c   : > { %v3317_v27 = vsel %vm3280_vm4, 0, %v997_v21 }
 0x17d   : > { %v805_v31 = vunpack.c.l.b16 %v688_v24  ;;  %v1165_v32 = vshll.u32 %v3317_v27, 16  ;;  %v1163_v34 = vshrl.u32 %v3317_v27, 16  ;;  %v1172_v45 = vrot.slane %v1170_v30, 1  ;;  %v2764_v30 = vld [vmem:[%s4150_s2 + $0x20] sm:$0xff] }
 0x17e   : > { %v599_v33 = vpop.f32.mrf.mxu0 }
 0x17f   : > { %v1167_v35 = vrot.slane %v1165_v32, 1  ;;  %v3323_v41 = vpack.c.b16 %v805_v31, %v804_v28  ;;  %v600_v42 = vadd.f32 %v3199_v16, %v599_v33 }
 0x181   : > { %v1168_v44 = vor.u32 %v1167_v35, %v1163_v34  ;;  %v653_v48 = vmax.f32 %v600_v42, 0.0 }
 0x183   : > { %v1173_v37 = vsel %vm1149_vm5, %v1168_v44, %v1172_v45  ;;  %v689_v56 = vpack.c.bf16 %v653_v48, %v653_v48  ;;  %v2763_v44 = vld [vmem:[%s4150_s2 + $0x18] sm:$0xff] }
 0x184   : > { %1344 = vrot.lane.b32.xlu2 %v1173_v37, %s3060_s14  ;;  %v842_v3 = vpop.permute.xlu0 %841 }
 0x185   : > { %v806_v63 = vunpack.c.l.b16 %v689_v56  ;;  %v916_v6 = vsel %vm904_vm0, %v3229_v10, %v842_v3  ;;  %v2765_v10 = vld [vmem:[%s4150_s2 + $0x28] sm:$0xff] }
 0x186   : > { %v601_v51 = vpop.f32.mrf.mxu0  ;;  %1766 = vmatpush.bf16.msra.mxu1 %v2765_v10  ;;  %2878 = vmatpush.bf16.msra.mxu2 %v2765_v10 }
 0x187   : > { %v602_v54 = vadd.f32 %v3199_v16, %v601_v51 }
 0x189   : > { %v654_v57 = vmax.f32 %v602_v54, 0.0  ;;  %v2762_v54 = vld [vmem:[%s4150_s2 + $0x10] sm:$0xff] }
 0x18a   : > { %1767 = vmatpush.bf16.msra.mxu1 %v2764_v30  ;;  %2879 = vmatpush.bf16.msra.mxu2 %v2764_v30 }
 0x18b   : > { %v690_v59 = vpack.c.bf16 %v654_v57, %v654_v57 }
 0x18c   : > { %1346 = vrot.lane.b32.xlu2 %v1185_v61, %s3060_s14 }
 0x18d   : > { %v807_v62 = vunpack.c.l.b16 %v690_v59 }
 0x18e   : > { %v604_v0 = vpop.f32.mrf.mxu0  ;;  %1768 = vmatpush.bf16.msra.mxu1 %v2763_v44  ;;  %2880 = vmatpush.bf16.msra.mxu2 %v2763_v44 }
 0x18f   : > { %v3337_v2 = vpack.c.b16 %v807_v62, %v806_v63  ;;  %v605_v5 = vadd.f32 %v3199_v16, %v604_v0  ;;  %v2761_v62 = vld [vmem:[%s4150_s2 + $0x8] sm:$0xff] }
 0x191   : > { %857 = vrot.lane.b32.xlu0 %v3337_v2, %s3058_s28  ;;  %v655_v11 = vmax.f32 %v605_v5, 0.0 }
 0x192   : > { %1769 = vmatpush.bf16.msra.mxu1 %v2762_v54  ;;  %2881 = vmatpush.bf16.msra.mxu2 %v2762_v54 }
 0x193   : > { %v879_v7 = vpop.permute.xlu1 %878  ;;  %v691_v19 = vpack.c.bf16 %v655_v11, %v655_v11 }
 0x194   : > { %v961_v8 = vsel %vm953_vm1, %v916_v6, %v879_v7  ;;  %847 = vrot.lane.b32.xlu2 %v3261_v1, %s3058_s28  ;;  %v844_v39 = vpop.permute.xlu0 %843 }
 0x195   : > { %v1004_v12 = vshrl.u32 %v961_v8, 16  ;;  %v1007_v17 = vshll.u32 %v961_v8, 16  ;;  %v808_v31 = vunpack.c.l.b16 %v691_v19  ;;  %v919_v47 = vsel %vm904_vm0, %v3237_v23, %v844_v39  ;;  %v2760_v8 = vld [vmem:[%s4150_s2] sm:$0xff] }
 0x196   : > { %v606_v13 = vpop.f32.mrf.mxu0  ;;  %1770 = vmatpush.bf16.msra.mxu1 %v2761_v62  ;;  %2882 = vmatpush.bf16.msra.mxu2 %v2761_v62 }
 0x197   : > { %v1006_v15 = vrot.slane %v1004_v12, 7  ;;  %v607_v18 = vadd.f32 %v3199_v16, %v606_v13 }
 0x199   : > { %v1009_v20 = vor.u32 %v1007_v17, %v1006_v15  ;;  %v656_v50 = vmax.f32 %v607_v18, 0.0  ;;  %884 = vrot.lane.b32.xlu0 %v3267_v14, %s3059_s9  ;;  %v3369_v34 = vsel %vm3280_vm4, %v1006_v15, 0 }
 0x19a   : > { %v1194_v37 = vshll.u32 %v3369_v34, 16  ;;  %1771 = vmatpush.bf16.msra.mxu1 %v2760_v8  ;;  %2883 = vmatpush.bf16.msra.mxu2 %v2760_v8 }
 0x19b   : > { %v3361_v21 = vsel %vm3280_vm4, 0, %v1009_v20  ;;  %v692_v24 = vpack.c.bf16 %v656_v50, %v656_v50 }
 0x19c   : > { %v1189_v28 = vshll.u32 %v3361_v21, 16  ;;  %v1187_v38 = vshrl.u32 %v3361_v21, 16  ;;  %v1196_v58 = vrot.slane %v1194_v37, 1 }
 0x19d   : > { %v809_v32 = vunpack.c.l.b16 %v692_v24 }
 0x19e   : > { %v609_v33 = vpop.f32.mrf.mxu0  ;;  %v1191_v42 = vrot.slane %v1189_v28, 1 }
 0x19f   : > { %v3371_v35 = vpack.c.b16 %v809_v32, %v808_v31  ;;  %v610_v45 = vadd.f32 %v3199_v16, %v609_v33 }
 0x1a0   : > { %v1192_v51 = vor.u32 %v1191_v42, %v1187_v38 }
 0x1a1   : > { %894 = vrot.lane.b32.xlu1 %v3371_v35, %s3059_s9  ;;  %859 = vrot.lane.b32.xlu2 %v3371_v35, %s3058_s28  ;;  %v657_v55 = vmax.f32 %v610_v45, 0.0 }
 0x1a2   : > { %v1197_v23 = vsel %vm1149_vm5, %v1192_v51, %v1196_v58 }
 0x1a3   : > { %v881_v48 = vpop.permute.xlu1 %880  ;;  %v693_v0 = vpack.c.bf16 %v657_v55, %v657_v55 }
 0x1a4   : > { %v963_v49 = vsel %vm953_vm1, %v919_v47, %v881_v48  ;;  %v846_v17 = vpop.permute.xlu0 %845 }
 0x1a5   : > { %v1010_v56 = vshrl.u32 %v963_v49, 16  ;;  %v1013_v61 = vshll.u32 %v963_v49, 16  ;;  %v810_v9 = vunpack.c.l.b16 %v693_v0  ;;  %v922_v50 = vsel %vm904_vm0, %v3245_v36, %v846_v17 }
 0x1a6   : > { %v611_v57 = vpop.f32.mrf.mxu0 }
 0x1a7   : > { %v1012_v59 = vrot.slane %v1010_v56, 7  ;;  %v612_v63 = vadd.f32 %v3199_v16, %v611_v57 }
 0x1a9   : > { %v1015_v3 = vor.u32 %v1013_v61, %v1012_v59  ;;  %v658_v4 = vmax.f32 %v612_v63, 0.0  ;;  %1348 = vrot.lane.b32.xlu1 %v1197_v23, %s3060_s14  ;;  %886 = vrot.lane.b32.xlu2 %v3271_v29, %s3059_s9  ;;  %v3407_v13 = vsel %vm3280_vm4, %v1012_v59, 0 }
 0x1aa   : > { %v1206_v19 = vshll.u32 %v3407_v13, 16 }
 0x1ab   : > { %v3399_v5 = vsel %vm3280_vm4, 0, %v1015_v3  ;;  %v694_v6 = vpack.c.bf16 %v658_v4, %v658_v4 }
 0x1ac   : > { %v1201_v7 = vshll.u32 %v3399_v5, 16  ;;  %v1199_v20 = vshrl.u32 %v3399_v5, 16  ;;  %v1208_v39 = vrot.slane %v1206_v19, 1 }
 0x1ad   : > { %v811_v11 = vunpack.c.l.b16 %v694_v6 }
 0x1ae   : > { %v614_v12 = vpop.f32.mrf.mxu0  ;;  %v1203_v18 = vrot.slane %v1201_v7, 1 }
 0x1af   : > { %v3409_v15 = vpack.c.b16 %v811_v11, %v810_v9  ;;  %v615_v10 = vadd.f32 %v3199_v16, %v614_v12 }
 0x1b0   : > { %v1204_v30 = vor.u32 %v1203_v18, %v1199_v20 }
 0x1b1   : > { %896 = vrot.lane.b32.xlu0 %v3409_v15, %s3059_s9  ;;  %849 = vrot.lane.b32.xlu1 %v3267_v14, %s3058_s28  ;;  %v659_v31 = vmax.f32 %v615_v10, 0.0 }
 0x1b2   : > { %v1209_v37 = vsel %vm1149_vm5, %v1204_v30, %v1208_v39 }
 0x1b3   : > { %v883_v24 = vpop.permute.xlu1 %882  ;;  %v695_v38 = vpack.c.bf16 %v659_v31, %v659_v31 }
 0x1b4   : > { %v965_v28 = vsel %vm953_vm1, %v922_v50, %v883_v24 }
 0x1b5   : > { %v1016_v32 = vshrl.u32 %v965_v28, 16  ;;  %v1019_v44 = vshll.u32 %v965_v28, 16  ;;  %v812_v51 = vunpack.c.l.b16 %v695_v38 }
 0x1b6   : > { %v616_v33 = vpop.f32.mrf.mxu0 }
 0x1b7   : > { %v1018_v42 = vrot.slane %v1016_v32, 7  ;;  %v617_v45 = vadd.f32 %v3199_v16, %v616_v33 }
 0x1b9   : > { %v1021_v47 = vor.u32 %v1019_v44, %v1018_v42  ;;  %v660_v48 = vmax.f32 %v617_v45, 0.0  ;;  %861 = vrot.lane.b32.xlu1 %v3409_v15, %s3058_s28  ;;  %1350 = vrot.lane.b32.xlu0 %v1209_v37, %s3060_s14  ;;  %v3435_v58 = vsel %vm3280_vm4, %v1018_v42, 0 }
 0x1ba   : > { %v1218_v63 = vshll.u32 %v3435_v58, 16 }
 0x1bb   : > { %v3428_v36 = vsel %vm3280_vm4, 0, %v1021_v47  ;;  %v696_v49 = vpack.c.bf16 %v660_v48, %v660_v48 }
 0x1bc   : > { %v1213_v55 = vshll.u32 %v3428_v36, 16  ;;  %v1211_v23 = vshrl.u32 %v3428_v36, 16  ;;  %v1220_v6 = vrot.slane %v1218_v63, 1 }
 0x1bd   : > { %v813_v54 = vunpack.c.l.b16 %v696_v49 }
 0x1be   : > { %v619_v56 = vpop.f32.mrf.mxu0  ;;  %v1215_v61 = vrot.slane %v1213_v55, 1 }
 0x1bf   : > { %v3431_v57 = vpack.c.b16 %v813_v54, %v812_v51  ;;  %v620_v59 = vadd.f32 %v3199_v16, %v619_v56 }
 0x1c0   : > { %v1216_v0 = vor.u32 %v1215_v61, %v1211_v23 }
 0x1c1   : > { %888 = vrot.lane.b32.xlu1 %v3297_v60, %s3059_s9  ;;  %851 = vrot.lane.b32.xlu0 %v3271_v29, %s3058_s28  ;;  %v661_v62 = vmax.f32 %v620_v59, 0.0 }
 0x1c2   : > { %898 = vrot.lane.b32.xlu2 %v3431_v57, %s3059_s9  ;;  %v1221_v9 = vsel %vm1149_vm5, %v1216_v0, %v1220_v6 }
 0x1c3   : > { %v697_v7 = vpack.c.bf16 %v661_v62, %v661_v62 }
 0x1c5   : > { %v832_v12 = vunpack.c.l.b16 %v697_v7 }
 0x1c6   : > { %v621_v3 = vpop.f32.mrf.mxu0 }
 0x1c7   : > { %v622_v4 = vadd.f32 %v3199_v16, %v621_v3 }
 0x1c9   : > { %v662_v8 = vmax.f32 %v622_v4, 0.0  ;;  %863 = vrot.lane.b32.xlu0 %v3431_v57, %s3058_s28 }
 0x1ca   : > { %1352 = vrot.lane.b32.xlu2 %v1221_v9, %s3060_s14 }
 0x1cb   : > { %v698_v11 = vpack.c.bf16 %v662_v8, %v662_v8 }
 0x1cd   : > { %v833_v17 = vunpack.c.l.b16 %v698_v11 }
 0x1ce   : > { %v624_v18 = vpop.f32.mrf.mxu0  ;;  %v3451_v10 = vpop.permute.xlu2 %1342 }
 0x1cf   : > { %v625_v19 = vadd.f32 %v3199_v16, %v624_v18  ;;  %v834_v20 = vpack.c.b16 %v833_v17, %v832_v12  ;;  %v1489_v50 = vsel %vm1487_vm6, %v3292_v53, %v3451_v10 }
 0x1d0   : > { %1772 = vmatmul.bf16.vlgmr.msra.gmra.mxu1 %v1489_v50 }
 0x1d1   : > { %v663_v24 = vmax.f32 %v625_v19, 0.0  ;;  %900 = vrot.lane.b32.xlu1 %v834_v20, %s3059_s9  ;;  %853 = vrot.lane.b32.xlu0 %v3297_v60, %s3058_s28 }
 0x1d3   : > { %v699_v28 = vpack.c.bf16 %v663_v24, %v663_v24 }
 0x1d5   : > { %v743_v31 = vunpack.c.l.bf16 %v699_v28 }
 0x1d6   : > { %v626_v30 = vpop.f32.mrf.mxu0 }
 0x1d7   : > { %v627_v32 = vadd.f32 %v3199_v16, %v626_v30  ;;  %v746_v39 = vmul.f32 %v743_v31, %v3202_v25 }
 0x1d9   : > { %v664_v33 = vmax.f32 %v627_v32, 0.0  ;;  %890 = vrot.lane.b32.xlu1 %v3323_v41, %s3059_s9  ;;  %865 = vrot.lane.b32.xlu0 %v834_v20, %s3058_s28  ;;  %v748_v37 = vpack.c.bf16 %v746_v39, %v746_v39 }
 0x1db   : > { %v700_v42 = vpack.c.bf16 %v664_v33, %v664_v33  ;;  %v869_v48 = vunpack.c.l.b16 %v748_v37 }
 0x1dd   : > { %v744_v44 = vunpack.c.l.bf16 %v700_v42 }
 0x1de   : > { %v3465_v45 = vpop.permute.xlu2 %1344 }
 0x1df   : > { %v747_v38 = vmul.f32 %v744_v44, %v3202_v25  ;;  %v1492_v47 = vsel %vm1487_vm6, %v3317_v27, %v3465_v45 }
 0x1e0   : > { %1777 = vmatmul.bf16.gmra.mxu1 %v1492_v47 }
 0x1e1   : > { %v749_v16 = vpack.c.bf16 %v747_v38, %v747_v38  ;;  %855 = vrot.lane.b32.xlu0 %v3323_v41, %s3058_s28 }
 0x1e3   : > { %v870_v49 = vunpack.c.l.b16 %v749_v16 }
 0x1e5   : > { %v871_v51 = vpack.c.b16 %v870_v49, %v869_v48 }
 0x1e6   : > { %v3474_v54 = vpop.permute.xlu2 %1346 }
 0x1e7   : > { %902 = vrot.lane.b32.xlu1 %v871_v51, %s3059_s9  ;;  %v1495_v25 = vsel %vm1487_vm6, %v3313_v26, %v3474_v54 }
 0x1ee   : > { %v848_v56 = vpop.permute.xlu2 %847 }
 0x1ef   : > { %892 = vrot.lane.b32.xlu1 %v3337_v2, %s3059_s9  ;;  %v925_v59 = vsel %vm904_vm0, %v3253_v52, %v848_v56 }
 0x1f0   : > { %1782 = vmatmul.bf16.gmra.mxu1 %v1495_v25 }
 0x1fb   : > { %v860_v17 = vpop.permute.xlu2 %859 }
 0x1fc   : > { %v943_v37 = vsel %vm904_vm0, %v3337_v2, %v860_v17 }
 0x203   : > { %v858_v55 = vpop.permute.xlu0 %857  ;;  %v887_v16 = vpop.permute.xlu2 %886 }
 0x204   : > { %v940_v62 = vsel %vm904_vm0, %v3323_v41, %v858_v55 }
 0x20b   : > { %v885_v61 = vpop.permute.xlu0 %884 }
 0x20c   : > { %v967_v63 = vsel %vm953_vm1, %v925_v59, %v885_v61 }
 0x20d   : > { %v1022_v23 = vshrl.u32 %v967_v63, 16  ;;  %v1025_v6 = vshll.u32 %v967_v63, 16 }
 0x20f   : > { %v1024_v0 = vrot.slane %v1022_v23, 7 }
 0x211   : > { %v1027_v8 = vor.u32 %v1025_v6, %v1024_v0  ;;  %v3510_v39 = vsel %vm3280_vm4, %v1024_v0, 0 }
 0x212   : > { %v1230_v48 = vshll.u32 %v3510_v39, 16 }
 0x213   : > { %v895_v3 = vpop.permute.xlu1 %894  ;;  %v3493_v18 = vsel %vm3280_vm4, 0, %v1027_v8 }
 0x214   : > { %v977_v4 = vsel %vm953_vm1, %v940_v62, %v895_v3  ;;  %v1225_v31 = vshll.u32 %v3493_v18, 16  ;;  %v1223_v25 = vshrl.u32 %v3493_v18, 16  ;;  %v1232_v0 = vrot.slane %v1230_v48, 1 }
 0x215   : > { %v1052_v7 = vshrl.u32 %v977_v4, 16  ;;  %v1055_v11 = vshll.u32 %v977_v4, 16 }
 0x216   : > { %v1227_v44 = vrot.slane %v1225_v31, 1 }
 0x217   : > { %v1054_v9 = vrot.slane %v1052_v7, 7 }
 0x218   : > { %v1228_v61 = vor.u32 %v1227_v44, %v1223_v25 }
 0x219   : > { %v1057_v12 = vor.u32 %v1055_v11, %v1054_v9  ;;  %v3489_v52 = vsel %vm3280_vm4, %v1054_v9, 0  ;;  %v2777_v11 = vld [vmem:[%s4150_s2 + $0x88] sm:$0xff] }
 0x21a   : > { %v1290_v20 = vshll.u32 %v3489_v52, 16  ;;  %2884 = vmatpush.bf16.msra.mxu3 %v2777_v11  ;;  %1948 = vmatpush.bf16.msrb.mxu1 %v2777_v11 }
 0x21b   : > { %v3497_v41 = vsel %vm3280_vm4, 0, %v1057_v12  ;;  %v3499_v19 = vpop.permute.xlu1 %1348 }
 0x21c   : > { %v1498_v50 = vsel %vm1487_vm6, %v3361_v21, %v3499_v19  ;;  %v1285_v24 = vshll.u32 %v3497_v41, 16  ;;  %v1283_v28 = vshrl.u32 %v3497_v41, 16  ;;  %v1292_v33 = vrot.slane %v1290_v20, 1  ;;  %v899_v12 = vpop.permute.xlu2 %898 }
 0x21d   : > { %1787 = vmatmul.bf16.gmra.mxu1 %v1498_v50 }
 0x21e   : > { %v1287_v30 = vrot.slane %v1285_v24, 1 }
 0x220   : > { %v1288_v32 = vor.u32 %v1287_v30, %v1283_v28 }
 0x222   : > { %v1293_v42 = vsel %vm1149_vm5, %v1288_v32, %v1292_v33 }
 0x223   : > { %v850_v38 = vpop.permute.xlu1 %849  ;;  %v897_v47 = vpop.permute.xlu0 %896  ;;  %1364 = vrot.lane.b32.xlu2 %v1293_v42, %s3060_s14 }
 0x224   : > { %v928_v49 = vsel %vm904_vm0, %v3261_v1, %v850_v38  ;;  %v979_v51 = vsel %vm953_vm1, %v943_v37, %v897_v47  ;;  %v1233_v1 = vsel %vm1149_vm5, %v1228_v61, %v1232_v0 }
 0x225   : > { %v969_v55 = vsel %vm953_vm1, %v928_v49, %v887_v16  ;;  %v1058_v56 = vshrl.u32 %v979_v51, 16  ;;  %v1061_v63 = vshll.u32 %v979_v51, 16 }
 0x226   : > { %v1028_v59 = vshrl.u32 %v969_v55, 16  ;;  %v1031_v62 = vshll.u32 %v969_v55, 16 }
 0x227   : > { %v1060_v2 = vrot.slane %v1058_v56, 7 }
 0x228   : > { %v1030_v23 = vrot.slane %v1028_v59, 7 }
 0x229   : > { %v1063_v3 = vor.u32 %v1061_v63, %v1060_v2  ;;  %v3524_v6 = vsel %vm3280_vm4, %v1060_v2, 0 }
 0x22a   : > { %v1033_v4 = vor.u32 %v1031_v62, %v1030_v23  ;;  %v1302_v24 = vshll.u32 %v3524_v6, 16  ;;  %v3553_v37 = vsel %vm3280_vm4, %v1030_v23, 0 }
 0x22b   : > { %v3529_v7 = vsel %vm3280_vm4, 0, %v1063_v3  ;;  %v862_v8 = vpop.permute.xlu1 %861  ;;  %v3531_v9 = vpop.permute.xlu0 %1350  ;;  %1354 = vrot.lane.b32.xlu2 %v1233_v1, %s3060_s14  ;;  %v1242_v61 = vshll.u32 %v3553_v37, 16 }
 0x22c   : > { %v3539_v17 = vsel %vm3280_vm4, 0, %v1033_v4  ;;  %v946_v20 = vsel %vm904_vm0, %v3371_v35, %v862_v8  ;;  %v1501_v50 = vsel %vm1487_vm6, %v3399_v5, %v3531_v9  ;;  %v1297_v30 = vshll.u32 %v3529_v7, 16 }
 0x22d   : > { %v981_v28 = vsel %vm953_vm1, %v946_v20, %v899_v12  ;;  %1792 = vmatmul.bf16.gmra.mxu1 %v1501_v50  ;;  %v1295_v32 = vshrl.u32 %v3529_v7, 16  ;;  %v1237_v42 = vshll.u32 %v3539_v17, 16  ;;  %v1304_v47 = vrot.slane %v1302_v24, 1 }
 0x22e   : > { %v1064_v31 = vshrl.u32 %v981_v28, 16  ;;  %v1299_v33 = vrot.slane %v1297_v30, 1  ;;  %v1067_v44 = vshll.u32 %v981_v28, 16  ;;  %v1235_v63 = vshrl.u32 %v3539_v17, 16 }
 0x22f   : > { %v1239_v55 = vrot.slane %v1237_v42, 1  ;;  %v1244_v12 = vrot.slane %v1242_v61, 1 }
 0x230   : > { %v1066_v35 = vrot.slane %v1064_v31, 7  ;;  %v1300_v38 = vor.u32 %v1299_v33, %v1295_v32 }
 0x231   : > { %v1240_v3 = vor.u32 %v1239_v55, %v1235_v63 }
 0x232   : > { %v1069_v16 = vor.u32 %v1067_v44, %v1066_v35  ;;  %v3557_v48 = vsel %vm3280_vm4, %v1066_v35, 0  ;;  %v1305_v25 = vsel %vm1149_vm5, %v1300_v38, %v1304_v47 }
 0x233   : > { %v889_v49 = vpop.permute.xlu1 %888  ;;  %v852_v51 = vpop.permute.xlu0 %851  ;;  %1366 = vrot.lane.b32.xlu2 %v1305_v25, %s3060_s14  ;;  %v1314_v62 = vshll.u32 %v3557_v48, 16  ;;  %v1245_v30 = vsel %vm1149_vm5, %v1240_v3, %v1244_v12 }
 0x234   : > { %v3562_v56 = vsel %vm3280_vm4, 0, %v1069_v16  ;;  %v931_v59 = vsel %vm904_vm0, %v3267_v14, %v852_v51  ;;  %v3573_v14 = vpop.permute.xlu2 %1352 }
 0x235   : > { %v971_v2 = vsel %vm953_vm1, %v931_v59, %v889_v49  ;;  %v1309_v23 = vshll.u32 %v3562_v56, 16  ;;  %v1307_v4 = vshrl.u32 %v3562_v56, 16  ;;  %v1316_v50 = vrot.slane %v1314_v62, 1 }
 0x236   : > { %v1034_v0 = vshrl.u32 %v971_v2, 16  ;;  %v1037_v11 = vshll.u32 %v971_v2, 16  ;;  %v1504_v33 = vsel %vm1487_vm6, %v3428_v36, %v3573_v14 }
 0x237   : > { %v1311_v1 = vrot.slane %v1309_v23, 1 }
 0x238   : > { %v1036_v8 = vrot.slane %v1034_v0, 7 }
 0x239   : > { %v1312_v20 = vor.u32 %v1311_v1, %v1307_v4 }
 0x23a   : > { %v1039_v24 = vor.u32 %v1037_v11, %v1036_v8  ;;  %v3577_v28 = vsel %vm3280_vm4, %v1036_v8, 0 }
 0x23b   : > { %v1317_v31 = vsel %vm1149_vm5, %v1312_v20, %v1316_v50  ;;  %1356 = vrot.lane.b32.xlu2 %v1245_v30, %s3060_s14  ;;  %v1254_v35 = vshll.u32 %v3577_v28, 16  ;;  %v864_v44 = vpop.permute.xlu0 %863 }
 0x23c   : > { %v3583_v32 = vsel %vm3280_vm4, 0, %v1039_v24  ;;  %1368 = vrot.lane.b32.xlu0 %v1317_v31, %s3060_s14  ;;  %v949_v51 = vsel %vm904_vm0, %v3409_v15, %v864_v44 }
 0x23d   : > { %1797 = vmatmul.bf16.gmra.mxu1 %v1504_v33  ;;  %v1249_v42 = vshll.u32 %v3583_v32, 16  ;;  %v1247_v38 = vshrl.u32 %v3583_v32, 16  ;;  %v1256_v49 = vrot.slane %v1254_v35, 1 }
 0x23f   : > { %v1251_v47 = vrot.slane %v1249_v42, 1 }
 0x241   : > { %v1252_v16 = vor.u32 %v1251_v47, %v1247_v38 }
 0x243   : > { %v901_v25 = vpop.permute.xlu1 %900  ;;  %v1257_v55 = vsel %vm1149_vm5, %v1252_v16, %v1256_v49  ;;  %v854_v23 = vpop.permute.xlu0 %853 }
 0x244   : > { %v983_v59 = vsel %vm953_vm1, %v949_v51, %v901_v25  ;;  %1358 = vrot.lane.b32.xlu1 %v1257_v55, %s3060_s14  ;;  %v934_v15 = vsel %vm904_vm0, %v3271_v29, %v854_v23 }
 0x245   : > { %v1070_v61 = vshrl.u32 %v983_v59, 16  ;;  %v1073_v63 = vshll.u32 %v983_v59, 16 }
 0x247   : > { %v1072_v2 = vrot.slane %v1070_v61, 7 }
 0x249   : > { %v1075_v62 = vor.u32 %v1073_v63, %v1072_v2  ;;  %v3600_v0 = vsel %vm3280_vm4, %v1072_v2, 0 }
 0x24a   : > { %v1326_v1 = vshll.u32 %v3600_v0, 16 }
 0x24b   : > { %v3604_v3 = vsel %vm3280_vm4, 0, %v1075_v62  ;;  %v891_v4 = vpop.permute.xlu1 %890  ;;  %v866_v47 = vpop.permute.xlu0 %865 }
 0x24c   : > { %v973_v8 = vsel %vm953_vm1, %v934_v15, %v891_v4  ;;  %v1321_v11 = vshll.u32 %v3604_v3, 16  ;;  %v1319_v20 = vshrl.u32 %v3604_v3, 16  ;;  %v1328_v33 = vrot.slane %v1326_v1, 1 }
 0x24d   : > { %v1040_v12 = vshrl.u32 %v973_v8, 16  ;;  %v1043_v30 = vshll.u32 %v973_v8, 16  ;;  %v952_v59 = vsel %vm904_vm0, %v3431_v57, %v866_v47  ;;  %v1407_v1 = vrot.slane %v3292_v53, 1 }
 0x24e   : > { %v1323_v50 = vrot.slane %v1321_v11, 1  ;;  %v1408_v57 = vrot.slane %v3286_v40, 1 }
 0x24f   : > { %v1042_v24 = vrot.slane %v1040_v12, 7 }
 0x250   : > { %v1324_v31 = vor.u32 %v1323_v50, %v1319_v20 }
 0x251   : > { %v1045_v42 = vor.u32 %v1043_v30, %v1042_v24  ;;  %v3614_v35 = vsel %vm3280_vm4, %v1042_v24, 0  ;;  %v1409_v30 = vsel %vm1406_vm7, %v1407_v1, %v1408_v57  ;;  %v1441_v57 = vrot.slane %v3489_v52, 1 }
 0x252   : > { %v1329_v29 = vsel %vm1149_vm5, %v1324_v31, %v1328_v33  ;;  %v1266_v38 = vshll.u32 %v3614_v35, 16 }
 0x253   : > { %v3619_v44 = vsel %vm3280_vm4, 0, %v1045_v42  ;;  %1370 = vrot.lane.b32.xlu2 %v1329_v29, %s3060_s14  ;;  %v856_v4 = vpop.permute.xlu0 %855 }
 0x254   : > { %v1261_v16 = vshll.u32 %v3619_v44, 16  ;;  %v1259_v49 = vshrl.u32 %v3619_v44, 16  ;;  %v1268_v55 = vrot.slane %v1266_v38, 1  ;;  %v937_v12 = vsel %vm904_vm0, %v3297_v60, %v856_v4 }
 0x255   : > { %v1440_v4 = vrot.slane %v3497_v41, 1 }
 0x256   : > { %v1263_v51 = vrot.slane %v1261_v16, 1  ;;  %v1416_v16 = vrot.slane %v3361_v21, 1  ;;  %v1410_v21 = vrot.slane %v3317_v27, 1 }
 0x257   : > { %v1442_v27 = vsel %vm1406_vm7, %v1440_v4, %v1441_v57  ;;  %v2773_v4 = vld [vmem:[%s4150_s2 + $0x68] sm:$0xff]  ;;  %v2772_v57 = vld [vmem:[%s4150_s2 + $0x60] sm:$0xff] }
 0x258   : > { %v1264_v25 = vor.u32 %v1263_v51, %v1259_v49 }
 0x259   : > { %v903_v61 = vpop.permute.xlu1 %902 }
 0x25a   : > { %v985_v2 = vsel %vm953_vm1, %v952_v59, %v903_v61  ;;  %v1269_v63 = vsel %vm1149_vm5, %v1264_v25, %v1268_v55  ;;  %v1417_v55 = vrot.slane %v3369_v34, 1  ;;  %v1411_v34 = vrot.slane %v3309_v22, 1 }
 0x25b   : > { %v1076_v23 = vshrl.u32 %v985_v2, 16  ;;  %1360 = vrot.lane.b32.xlu0 %v1269_v63, %s3060_s14  ;;  %v1079_v15 = vshll.u32 %v985_v2, 16 }
 0x25c   : > { %v1418_v2 = vsel %vm1406_vm7, %v1416_v16, %v1417_v55  ;;  %v1412_v1 = vsel %vm1406_vm7, %v1410_v21, %v1411_v34  ;;  %v1450_v16 = vrot.slane %v3600_v0, 1  ;;  %v1447_v55 = vrot.slane %v3557_v48, 1 }
 0x25d   : > { %v1078_v62 = vrot.slane %v1076_v23, 7  ;;  %v1435_v21 = vrot.slane %v3614_v35, 1  ;;  %v1432_v34 = vrot.slane %v3577_v28, 1 }
 0x25f   : > { %v1081_v8 = vor.u32 %v1079_v15, %v1078_v62  ;;  %v3633_v11 = vsel %vm3280_vm4, %v1078_v62, 0 }
 0x260   : > { %v1338_v24 = vshll.u32 %v3633_v11, 16 }
 0x261   : > { %v3640_v20 = vsel %vm3280_vm4, 0, %v1081_v8  ;;  %v893_v50 = vpop.permute.xlu1 %892 }
 0x262   : > { %v975_v53 = vsel %vm953_vm1, %v937_v12, %v893_v50  ;;  %v1333_v31 = vshll.u32 %v3640_v20, 16  ;;  %v1331_v40 = vshrl.u32 %v3640_v20, 16  ;;  %v1340_v47 = vrot.slane %v1338_v24, 1 }
 0x263   : > { %v1046_v33 = vshrl.u32 %v975_v53, 16  ;;  %1455 = vrot.lane.b32.xlu0 %v1409_v30, %s3059_s9  ;;  %v1049_v29 = vshll.u32 %v975_v53, 16  ;;  %v1413_v12 = vrot.slane %v3313_v26, 1  ;;  %v1414_v24 = vrot.slane %v3328_v46, 1  ;;  %v2775_v26 = vld [vmem:[%s4150_s2 + $0x78] sm:$0xff]  ;;  %v2776_v46 = vld [vmem:[%s4150_s2 + $0x80] sm:$0xff] }
 0x264   : > { %v1335_v42 = vrot.slane %v1333_v31, 1  ;;  %v1425_v53 = vrot.slane %v3493_v18, 1  ;;  %v1426_v31 = vrot.slane %v3510_v39, 1  ;;  %v1419_v39 = vrot.slane %v3399_v5, 1  ;;  %1853 = vmatpush.bf16.msrb.mxu2 %v2775_v26  ;;  %1949 = vmatpush.bf16.msrb.mxu1 %v2776_v46  ;;  %v2768_v26 = vld [vmem:[%s4150_s2 + $0x40] sm:$0xff] }
 0x265   : > { %v1048_v60 = vrot.slane %v1046_v33, 7  ;;  %v1415_v52 = vsel %vm1406_vm7, %v1413_v12, %v1414_v24  ;;  %2885 = vmatpush.bf16.msra.mxu3 %v2776_v46 }
 0x266   : > { %v1336_v38 = vor.u32 %v1335_v42, %v1331_v40  ;;  %v1427_v33 = vsel %vm1406_vm7, %v1425_v53, %v1426_v31  ;;  %v1422_v40 = vrot.slane %v3428_v36, 1  ;;  %v2769_v53 = vld [vmem:[%s4150_s2 + $0x48] sm:$0xff] }
 0x267   : > { %v1051_v49 = vor.u32 %v1049_v29, %v1048_v60  ;;  %v1143_v51 = vsel %vm3280_vm4, %v1048_v60, 0  ;;  %v1423_v29 = vrot.slane %v3435_v58, 1  ;;  %v1443_v58 = vrot.slane %v3529_v7, 1 }
 0x268   : > { %v1341_v25 = vsel %vm1149_vm5, %v1336_v38, %v1340_v47  ;;  %v1278_v61 = vshll.u32 %v1143_v51, 16  ;;  %v1438_v50 = vrot.slane %v1143_v51, 1  ;;  %v1420_v38 = vrot.slane %v3407_v13, 1  ;;  %v2774_v13 = vld [vmem:[%s4150_s2 + $0x70] sm:$0xff] }
 0x269   : > { %v3655_v59 = vsel %vm3280_vm4, 0, %v1051_v49  ;;  %1372 = vrot.lane.b32.xlu1 %v1341_v25, %s3060_s14  ;;  %v1449_v47 = vrot.slane %v3604_v3, 1  ;;  %v1424_v36 = vsel %vm1406_vm7, %v1422_v40, %v1423_v29  ;;  %v1446_v49 = vrot.slane %v3562_v56, 1  ;;  %1854 = vmatpush.bf16.msrb.mxu2 %v2774_v13 }
 0x26a   : > { %v1273_v63 = vshll.u32 %v3655_v59, 16  ;;  %v1271_v23 = vshrl.u32 %v3655_v59, 16  ;;  %v1280_v43 = vrot.slane %v1278_v61, 1  ;;  %v1437_v22 = vrot.slane %v3655_v59, 1 }
 0x26b   : > { %1461 = vrot.lane.b32.xlu0 %v1418_v2, %s3059_s9  ;;  %v1421_v5 = vsel %vm1406_vm7, %v1419_v39, %v1420_v38  ;;  %v1444_v25 = vrot.slane %v3524_v6, 1  ;;  %v1434_v61 = vrot.slane %v3619_v44, 1  ;;  %v1431_v6 = vrot.slane %v3583_v32, 1 }
 0x26c   : > { %v1275_v62 = vrot.slane %v1273_v63, 1  ;;  %v1439_v30 = vsel %vm1406_vm7, %v1437_v22, %v1438_v50  ;;  %v1448_v63 = vsel %vm1406_vm7, %v1446_v49, %v1447_v55  ;;  %v2770_v50 = vld [vmem:[%s4150_s2 + $0x50] sm:$0xff] }
 0x26d   : > { %v1445_v2 = vsel %vm1406_vm7, %v1443_v58, %v1444_v25  ;;  %1855 = vmatpush.bf16.msrb.mxu2 %v2773_v4  ;;  %v2779_v25 = vld [vmem:[%s4151_s3 + $0x8] sm:$0xff] }
 0x26e   : > { %v1276_v15 = vor.u32 %v1275_v62, %v1271_v23  ;;  %v1436_v23 = vsel %vm1406_vm7, %v1434_v61, %v1435_v21  ;;  %v1429_v62 = vrot.slane %v3553_v37, 1  ;;  %v1452_v37 = vrot.slane %v3640_v20, 1  ;;  %2185 = vmatpush.bf16.msrb.mxu3 %v2779_v25 }
 0x270   : > { %v1281_v8 = vsel %vm1149_vm5, %v1276_v15, %v1280_v43  ;;  %v1433_v43 = vsel %vm1406_vm7, %v1431_v6, %v1432_v34 }
 0x271   : > { %1457 = vrot.lane.b32.xlu1 %v1412_v1, %s3059_s9  ;;  %1362 = vrot.lane.b32.xlu2 %v1281_v8, %s3060_s14  ;;  %s2780_s14 = sshll.u32 %s3046_s27, 7  ;;  %s2397_s27 = scalar_lea.sflag [#allocation5], %s242_s15 }
 0x272   : > { %1856 = vmatpush.bf16.msrb.mxu2 %v2772_v57  ;;  %s2411_s19 = scalar_lea.hbm %s4155_s7, %s2780_s14 }
 0x273   : > { %1477 = vrot.lane.b32.xlu0 %v1442_v27, %s3059_s9  ;;  %v3754_v27 = vpop.f32.mrf.mxu1  ;;  %s2414_s22 = sshll.u32 %s2411_s19, 4  ;;  %s2415_s22 = int_to_ptr.hbm [resolvable:$true] %s2414_s22 }
 0x274   : > { %s2988_s17 = sshra.s32 %s2415_s22, 4  ;;  %s2989_s17 = int_to_ptr.hbm [resolvable:$true] %s2988_s17 }
 0x275   : > { %s2990_s21 = scalar_lea.hbm %s2989_s17, 128  ;;  %p2995_p6 = scmp.lt.s32.totalorder %s2989_s17, %s4155_s7 }
 0x276   : > { %p2991_p2 = scmp.ne.s32.totalorder %s2989_s17, %s2990_s21  ;;  %p2996_p7 = scmp.lt.s32.totalorder %s2994_s8, %s2990_s21 }
 0x278   : > { %p2992_p3 = pnand %p2991_p2, %p3142_p4  ;;  %p2997_p9 = por %p2996_p7, %p2995_p6 }
 0x279   : > { %1475 = vrot.lane.b32.xlu1 %v1439_v30, %s3059_s9  ;;  %1459 = vrot.lane.b32.xlu2 %v1415_v52, %s3059_s9 }
 0x27a   : > { %p2993_p5 = pneg %p2992_p3 }
 0x27b   : > { %1467 = vrot.lane.b32.xlu0 %v1427_v33, %s3059_s9  ;;  %v3759_v22 = vpop.f32.mrf.mxu1 }
 0x27c   : > { %p2998_p10 = pnand %p2997_p9, %p2993_p5 }
 0x27d   : > { %v3691_v42 = vpop.permute.xlu2 %1364 }
 0x27e   : > { %v1522_v60 = vsel %vm1487_vm6, %v3497_v41, %v3691_v42  ;;  %v1451_v41 = vsel %vm1406_vm7, %v1449_v47, %v1450_v16 }
 0x27f   : > { %1827 = vmatmul.bf16.vlgmr.msra.gmra.mxu2 %v1522_v60 }
 0x281   : > { %1465 = vrot.lane.b32.xlu1 %v1424_v36, %s3059_s9  ;;  %1463 = vrot.lane.b32.xlu2 %v1421_v5, %s3059_s9 }
 0x283   : > { %1483 = vrot.lane.b32.xlu0 %v1451_v41, %s3059_s9  ;;  %v3769_v24 = vpop.f32.mrf.mxu1 }
 0x285   : > { %v3711_v51 = vpop.permute.xlu2 %1354 }
 0x286   : > { %v1507_v0 = vsel %vm1487_vm6, %v3493_v18, %v3711_v51  ;;  %v1428_v18 = vrot.slane %v3539_v17, 1 }
 0x287   : > { %1802 = vmatmul.bf16.gmra.mxu1 %v1507_v0 }
 0x288   : > { %v1430_v15 = vsel %vm1406_vm7, %v1428_v18, %v1429_v62 }
 0x289   : > { %1479 = vrot.lane.b32.xlu2 %v1445_v2, %s3059_s9  ;;  %1481 = vrot.lane.b32.xlu1 %v1448_v63, %s3059_s9 }
 0x28b   : > { %1473 = vrot.lane.b32.xlu0 %v1436_v23, %s3059_s9  ;;  %v3781_v31 = vpop.f32.mrf.mxu1 }
 0x28d   : > { %v3728_v48 = vpop.permute.xlu2 %1366 }
 0x28e   : > { %v1525_v35 = vsel %vm1487_vm6, %v3529_v7, %v3728_v48  ;;  %v1453_v7 = vrot.slane %v3633_v11, 1  ;;  %v2771_v11 = vld [vmem:[%s4150_s2 + $0x58] sm:$0xff] }
 0x28f   : > { %1832 = vmatmul.bf16.gmra.mxu2 %v1525_v35 }
 0x290   : > { %v1454_v8 = vsel %vm1406_vm7, %v1452_v37, %v1453_v7  ;;  %1857 = vmatpush.bf16.msrb.mxu2 %v2771_v11  ;;  %v2778_v37 = vld [vmem:[%s4151_s3] sm:$0xff] }
 0x291   : > { %1469 = vrot.lane.b32.xlu2 %v1430_v15, %s3059_s9  ;;  %1471 = vrot.lane.b32.xlu1 %v1433_v43, %s3059_s9 }
 0x292   : > { %2186 = vmatpush.bf16.msrb.mxu3 %v2778_v37 }
 0x293   : > { %v3789_v46 = vpop.f32.mrf.mxu1 }
 0x294   : > { %1858 = vmatpush.bf16.msrb.mxu2 %v2770_v50 }
 0x295   : > { %v3743_v28 = vpop.permute.xlu2 %1356 }
 0x296   : > { %v1510_v1 = vsel %vm1487_vm6, %v3539_v17, %v3743_v28 }
 0x297   : > { %1807 = vmatmul.bf16.gmra.mxu1 %v1510_v1 }
 0x298   : > { %1859 = vmatpush.bf16.msrb.mxu2 %v2769_v53 }
 0x299   : > { %1485 = vrot.lane.b32.xlu2 %v1454_v8, %s3059_s9 }
 0x29b   : > { %v3796_v39 = vpop.f32.mrf.mxu1 }
 0x29c   : > { %1860 = vmatpush.bf16.msrb.mxu2 %v2768_v26 }
 0x2a3   : > { %v3798_v60 = vpop.f32.mrf.mxu1 }
 0x2ab   : > { %v3807_v5 = vpop.f32.mrf.mxu1 }
 0x2ae   : > { %v3761_v17 = vpop.permute.xlu0 %1368 }
 0x2af   : > { %v1528_v12 = vsel %vm1487_vm6, %v3562_v56, %v3761_v17  ;;  %v3779_v56 = vpop.permute.xlu2 %1370 }
 0x2b0   : > { %1837 = vmatmul.bf16.gmra.mxu2 %v1528_v12  ;;  %v1531_v33 = vsel %vm1487_vm6, %v3604_v3, %v3779_v56 }
 0x2b6   : > { %v3774_v30 = vpop.permute.xlu1 %1358 }
 0x2b7   : > { %v1513_v52 = vsel %vm1487_vm6, %v3583_v32, %v3774_v30 }
 0x2b8   : > { %1812 = vmatmul.bf16.gmra.mxu1 %v1513_v52 }
 0x2c0   : > { %1842 = vmatmul.bf16.gmra.mxu2 %v1531_v33 }
 0x2cb   : > { %v1363_v3 = vpop.permute.xlu2 %1362 }
 0x2cc   : > { %v1519_v47 = vsel %vm1487_vm6, %v3655_v59, %v1363_v3 }
 0x2cd   : > { %v3791_v40 = vpop.permute.xlu0 %1360 }
 0x2ce   : > { %v1516_v32 = vsel %vm1487_vm6, %v3619_v44, %v3791_v40 }
 0x2cf   : > { %1817 = vmatmul.bf16.gmra.mxu1 %v1516_v32 }
 0x2d3   : > { %v1460_v58 = vpop.permute.xlu2 %1459 }
 0x2d5   : > { %v1456_v44 = vpop.permute.xlu0 %1455 }
 0x2d6   : > { %v1537_v41 = vsel %vm953_vm1, %v3451_v10, %v1456_v44 }
 0x2db   : > { %v3800_v29 = vpop.permute.xlu1 %1372  ;;  %v1464_v55 = vpop.permute.xlu2 %1463 }
 0x2dc   : > { %v1534_v38 = vsel %vm1487_vm6, %v3640_v20, %v3800_v29  ;;  %v3815_v20 = vpop.f32.mrf.mxu1 }
 0x2dd   : > { %1847 = vmatmul.bf16.gmra.mxu2 %v1534_v38  ;;  %v1462_v59 = vpop.permute.xlu0 %1461 }
 0x2de   : > { %v1546_v62 = vsel %vm953_vm1, %v3499_v19, %v1462_v59  ;;  %v1549_v19 = vsel %vm953_vm1, %v3531_v9, %v1464_v55 }
 0x2df   : > { %1822 = vmatmul.bf16.gmra.mxu1 %v1519_v47 }
 0x2e3   : > { %v1458_v36 = vpop.permute.xlu1 %1457  ;;  %v3832_v2 = vpop.permute.xlu2 %1479 }
 0x2e4   : > { %v3818_v49 = vpop.f32.mrf.mxu1  ;;  %v1540_v10 = vsel %vm953_vm1, %v3465_v45, %v1458_v36  ;;  %v1543_v45 = vsel %vm953_vm1, %v3474_v54, %v1460_v58 }
 0x2e5   : > { %v3820_v0 = vpop.permute.xlu0 %1477 }
 0x2eb   : > { %v1476_v16 = vpop.permute.xlu1 %1475  ;;  %v1470_v7 = vpop.permute.xlu2 %1469 }
 0x2ec   : > { %2696 = vmatmul.msk.bf16.vlgmr.msra.gmra.mxu3 %vm904_vm0, %v1476_v16  ;;  %v3813_v13 = vsel %vm953_vm1, %v1363_v3, %v1476_v16  ;;  %v3830_v61 = vpop.f32.mrf.mxu1  ;;  %v1558_v38 = vsel %vm953_vm1, %v3743_v28, %v1470_v7 }
 0x2ed   : > { %1861 = vmatmul.bf16.vlgmr.msrb.gmra.mxu2 %v1537_v41  ;;  %v1468_v35 = vpop.permute.xlu0 %1467 }
 0x2ee   : > { %v1555_v33 = vsel %vm953_vm1, %v3711_v51, %v1468_v35 }
 0x2ef   : > { %2686 = vmatmul.msk.bf16.vlgmr.msrb.gmra.mxu1 %vm904_vm0, %v1456_v44 }
 0x2f3   : > { %v1466_v21 = vpop.permute.xlu1 %1465  ;;  %v3878_v12 = vpop.permute.xlu2 %1485 }
 0x2f4   : > { %v3834_v63 = vpop.f32.mrf.mxu1  ;;  %v1552_v9 = vsel %vm953_vm1, %v3573_v14, %v1466_v21 }
 0x2f5   : > { %v3860_v4 = vpop.permute.xlu0 %1483 }
 0x2fb   : > { %v3845_v6 = vpop.permute.xlu1 %1481 }
 0x2fc   : > { %2697 = vmatmul.msk.bf16.gmra.mxu3 %vm904_vm0, %v3820_v0 }
 0x2fd   : > { %1866 = vmatmul.bf16.gmra.mxu2 %v1540_v10 }
 0x2ff   : > { %2687 = vmatmul.msk.bf16.gmra.mxu1 %vm904_vm0, %v1458_v36 }
 0x302   : > { %v3841_v23 = vpop.f32.mrf.mxu2 }
 0x303   : > { %v1472_v44 = vpop.permute.xlu1 %1471 }
 0x304   : > { %v3843_v18 = vpop.f32.mrf.mxu1  ;;  %v1561_v41 = vsel %vm953_vm1, %v3774_v30, %v1472_v44 }
 0x30a   : > { %v3851_v34 = vpop.f32.mrf.mxu2 }
 0x30c   : > { %2698 = vmatmul.msk.bf16.gmra.mxu3 %vm904_vm0, %v3832_v2  ;;  %v3853_v54 = vpop.f32.mrf.mxu1 }
 0x30d   : > { %1871 = vmatmul.bf16.gmra.mxu2 %v1543_v45 }
 0x30f   : > { %2688 = vmatmul.msk.bf16.gmra.mxu1 %vm904_vm0, %v1460_v58 }
 0x312   : > { %v3856_v15 = vpop.f32.mrf.mxu2 }
 0x314   : > { %v3858_v43 = vpop.f32.mrf.mxu1 }
 0x31a   : > { %v3870_v1 = vpop.f32.mrf.mxu2 }
 0x31c   : > { %2699 = vmatmul.msk.bf16.gmra.mxu3 %vm904_vm0, %v3845_v6  ;;  %v3872_v8 = vpop.f32.mrf.mxu1 }
 0x31d   : > { %1876 = vmatmul.bf16.gmra.mxu2 %v1546_v62 }
 0x31f   : > { %2689 = vmatmul.msk.bf16.gmra.mxu1 %vm904_vm0, %v1462_v59  ;;  %v3916_v59 = vld [vmem:[%s4153_s5] ss:$0 sm:$0xff] }
 0x320   : > { %v1774_v58 = vadd.f32 %v3916_v59, %v3754_v27 }
 0x32c   : > { %2700 = vmatmul.msk.bf16.gmra.mxu3 %vm904_vm0, %v3860_v4 }
 0x32d   : > { %1881 = vmatmul.bf16.gmra.mxu2 %v1549_v19 }
 0x32f   : > { %2690 = vmatmul.msk.bf16.gmra.mxu1 %vm904_vm0, %v1464_v55  ;;  %v1776_v55 = vadd.f32 %v3916_v59, %v3759_v22  ;;  %v1779_v22 = vadd.f32 %v3916_v59, %v3769_v24  ;;  %v1784_v24 = vadd.f32 %v3916_v59, %v3789_v46 }
 0x333   : > { %v3874_v57 = vpop.f32.mrf.mxu2 }
 0x335   : > { %v3876_v11 = vpop.f32.mrf.mxu1 }
 0x33b   : > { %v3885_v50 = vpop.f32.mrf.mxu2 }
 0x33c   : > { %2701 = vmatmul.msk.bf16.gmra.mxu3 %vm904_vm0, %v3878_v12 }
 0x33d   : > { %1886 = vmatmul.bf16.gmra.mxu2 %v1552_v9  ;;  %v3887_v53 = vpop.f32.mrf.mxu1 }
 0x33f   : > { %2691 = vmatmul.msk.bf16.gmra.mxu1 %vm904_vm0, %v1466_v21  ;;  %v1474_v21 = vpop.permute.xlu0 %1473 }
 0x340   : > { %v1564_v37 = vsel %vm953_vm1, %v3791_v40, %v1474_v21 }
 0x343   : > { %v3893_v26 = vpop.f32.mrf.mxu2 }
 0x34b   : > { %v3898_v14 = vpop.f32.mrf.mxu2 }
 0x34c   : > { %v3889_v52 = vpop.f32.mrf.mxu1 }
 0x34d   : > { %1891 = vmatmul.bf16.gmra.mxu2 %v1555_v33 }
 0x34f   : > { %2692 = vmatmul.msk.bf16.gmra.mxu1 %vm904_vm0, %v1468_v35 }
 0x354   : > { %v3896_v32 = vpop.f32.mrf.mxu1 }
 0x35c   : > { %v3900_v3 = vpop.f32.mrf.mxu1 }
 0x35d   : > { %1896 = vmatmul.bf16.gmra.mxu2 %v1558_v38 }
 0x35f   : > { %2693 = vmatmul.msk.bf16.gmra.mxu1 %vm904_vm0, %v1470_v7 }
 0x360   : > { %v3905_v47 = vpop.f32.mrf.mxu2 }
 0x364   : > { %v3907_v51 = vpop.f32.mrf.mxu1 }
 0x368   : > { %v3909_v36 = vpop.f32.mrf.mxu2 }
 0x36c   : > { %v1951_v16 = vpop.f32.mrf.mxu1 }
 0x36d   : > { %1901 = vmatmul.bf16.gmra.mxu2 %v1561_v41 }
 0x36f   : > { %2694 = vmatmul.msk.bf16.gmra.mxu1 %vm904_vm0, %v1472_v44 }
 0x370   : > { %v1862_v28 = vpop.f32.mrf.mxu2 }
 0x371   : > { %v1863_v25 = vadd.f32 %v1862_v28, %v1774_v58 }
 0x373   : > { %v1952_v30 = vadd.f32 %v1951_v16, %v1863_v25  ;;  %v1781_v16 = vadd.f32 %v3916_v59, %v3781_v31 }
 0x374   : > { %v1953_v10 = vpop.f32.mrf.mxu1 }
 0x375   : > { %v2031_v7 = vmax.f32 %v1952_v30, 0.0 }
 0x378   : > { %v1864_v45 = vpop.f32.mrf.mxu2 }
 0x379   : > { %v1865_v62 = vadd.f32 %v1864_v45, %v1776_v55  ;;  %v3932_v45 = vpop.f32.mrf.mxu3 }
 0x37b   : > { %v1954_v35 = vadd.f32 %v1953_v10, %v1865_v62 }
 0x37c   : > { %v1956_v19 = vpop.f32.mrf.mxu1 }
 0x37d   : > { %v2032_v9 = vmax.f32 %v1954_v35, 0.0  ;;  %1906 = vmatmul.bf16.gmra.mxu2 %v1564_v37  ;;  %v1786_v35 = vadd.f32 %v3916_v59, %v3796_v39  ;;  %v1789_v39 = vadd.f32 %v3916_v59, %v3798_v60 }
 0x37f   : > { %v2063_v33 = vpack.c.bf16 %v2032_v9, %v2031_v7  ;;  %2695 = vmatmul.msk.bf16.gmra.mxu1 %vm904_vm0, %v1474_v21 }
 0x380   : > { %v1867_v27 = vpop.f32.mrf.mxu2 }
 0x381   : > { %2710 = vmatmul.msk.bf16.vlgmr.msrb.gmra.mxu3 %vm904_vm0, %v2063_v33  ;;  %v1868_v44 = vadd.f32 %v1867_v27, %v1779_v22  ;;  %v1570_v27 = vsel %vm953_vm1, %v3691_v42, %v3820_v0 }
 0x383   : > { %v1957_v28 = vadd.f32 %v1956_v19, %v1868_v44  ;;  %v3939_v19 = vpop.f32.mrf.mxu3 }
 0x384   : > { %v1958_v38 = vpop.f32.mrf.mxu1 }
 0x385   : > { %v2033_v25 = vmax.f32 %v1957_v28, 0.0 }
 0x388   : > { %v1869_v41 = vpop.f32.mrf.mxu2 }
 0x389   : > { %v1870_v40 = vadd.f32 %v1869_v41, %v1781_v16 }
 0x38b   : > { %v1959_v58 = vadd.f32 %v1958_v38, %v1870_v40  ;;  %v3945_v16 = vpop.f32.mrf.mxu3  ;;  %v1791_v40 = vadd.f32 %v3916_v59, %v3807_v5  ;;  %v1794_v5 = vadd.f32 %v3916_v59, %v3815_v20 }
 0x38c   : > { %v1961_v10 = vpop.f32.mrf.mxu1 }
 0x38d   : > { %v2034_v55 = vmax.f32 %v1959_v58, 0.0  ;;  %1911 = vmatmul.bf16.gmra.mxu2 %v3813_v13 }
 0x38f   : > { %v2064_v21 = vpack.c.bf16 %v2034_v55, %v2033_v25 }
 0x390   : > { %v1872_v30 = vpop.f32.mrf.mxu2 }
 0x391   : > { %2711 = vmatmul.msk.bf16.gmra.mxu3 %vm904_vm0, %v2064_v21  ;;  %v1873_v31 = vadd.f32 %v1872_v30, %v1784_v24  ;;  %v1573_v21 = vsel %vm953_vm1, %v3728_v48, %v3832_v2 }
 0x393   : > { %v1962_v7 = vadd.f32 %v1961_v10, %v1873_v31  ;;  %v3951_v25 = vpop.f32.mrf.mxu3 }
 0x394   : > { %v1963_v62 = vpop.f32.mrf.mxu1 }
 0x395   : > { %v2035_v22 = vmax.f32 %v1962_v7, 0.0  ;;  %v1796_v7 = vadd.f32 %v3916_v59, %v3818_v49  ;;  %v1799_v49 = vadd.f32 %v3916_v59, %v3830_v61 }
 0x398   : > { %v1874_v37 = vpop.f32.mrf.mxu2 }
 0x399   : > { %v1875_v9 = vadd.f32 %v1874_v37, %v1786_v35 }
 0x39b   : > { %v1964_v13 = vadd.f32 %v1963_v62, %v1875_v9  ;;  %v3959_v37 = vpop.f32.mrf.mxu3 }
 0x39c   : > { %v1966_v33 = vpop.f32.mrf.mxu1 }
 0x39d   : > { %v2036_v38 = vmax.f32 %v1964_v13, 0.0  ;;  %1916 = vmatmul.bf16.gmra.mxu2 %v1570_v27  ;;  %v1576_v27 = vsel %vm953_vm1, %v3761_v17, %v3845_v6 }
 0x39f   : > { %v2065_v46 = vpack.c.bf16 %v2036_v38, %v2035_v22 }
 0x3a0   : > { %v1877_v44 = vpop.f32.mrf.mxu2 }
 0x3a1   : > { %2712 = vmatmul.msk.bf16.gmra.mxu3 %vm904_vm0, %v2065_v46  ;;  %v1878_v28 = vadd.f32 %v1877_v44, %v1789_v39 }
 0x3a3   : > { %v1967_v10 = vadd.f32 %v1966_v33, %v1878_v28  ;;  %v3966_v46 = vpop.f32.mrf.mxu3  ;;  %v1801_v28 = vadd.f32 %v3916_v59, %v3834_v63  ;;  %v1804_v63 = vadd.f32 %v3916_v59, %v3843_v18 }
 0x3a4   : > { %v1968_v41 = vpop.f32.mrf.mxu1 }
 0x3a5   : > { %v2037_v30 = vmax.f32 %v1967_v10, 0.0 }
 0x3a8   : > { %v1879_v58 = vpop.f32.mrf.mxu2 }
 0x3a9   : > { %v1880_v42 = vadd.f32 %v1879_v58, %v1791_v40 }
 0x3ab   : > { %v1969_v0 = vadd.f32 %v1968_v41, %v1880_v42  ;;  %v3973_v6 = vpop.f32.mrf.mxu3 }
 0x3ac   : > { %v1971_v55 = vpop.f32.mrf.mxu1 }
 0x3ad   : > { %v2038_v24 = vmax.f32 %v1969_v0, 0.0  ;;  %1921 = vmatmul.bf16.gmra.mxu2 %v1573_v21  ;;  %v1579_v0 = vsel %vm953_vm1, %v3779_v56, %v3860_v4 }
 0x3af   : > { %v2066_v60 = vpack.c.bf16 %v2038_v24, %v2037_v30 }
 0x3b0   : > { %v1882_v62 = vpop.f32.mrf.mxu2 }
 0x3b1   : > { %2713 = vmatmul.msk.bf16.gmra.mxu3 %vm904_vm0, %v2066_v60  ;;  %v1883_v35 = vadd.f32 %v1882_v62, %v1794_v5  ;;  %v1806_v5 = vadd.f32 %v3916_v59, %v3853_v54  ;;  %v1809_v54 = vadd.f32 %v3916_v59, %v3858_v43  ;;  %v1814_v43 = vadd.f32 %v3916_v59, %v3876_v11 }
 0x3b2   : > { %v1819_v11 = vadd.f32 %v3916_v59, %v3889_v52 }
 0x3b3   : > { %v1972_v13 = vadd.f32 %v1971_v55, %v1883_v35  ;;  %v3981_v24 = vpop.f32.mrf.mxu3 }
 0x3b4   : > { %v1973_v31 = vpop.f32.mrf.mxu1 }
 0x3b5   : > { %v2039_v22 = vmax.f32 %v1972_v13, 0.0 }
 0x3b8   : > { %v1884_v9 = vpop.f32.mrf.mxu2 }
 0x3b9   : > { %v1885_v48 = vadd.f32 %v1884_v9, %v1796_v7  ;;  %v1582_v9 = vsel %vm953_vm1, %v3800_v29, %v3878_v12 }
 0x3bb   : > { %v1974_v2 = vadd.f32 %v1973_v31, %v1885_v48  ;;  %v3988_v18 = vpop.f32.mrf.mxu3 }
 0x3bc   : > { %v1976_v33 = vpop.f32.mrf.mxu1 }
 0x3bd   : > { %v2040_v38 = vmax.f32 %v1974_v2, 0.0  ;;  %1926 = vmatmul.bf16.gmra.mxu2 %v1576_v27 }
 0x3bf   : > { %v2067_v20 = vpack.c.bf16 %v2040_v38, %v2039_v22  ;;  %v1811_v38 = vadd.f32 %v3916_v59, %v3872_v8 }
 0x3c0   : > { %v1887_v44 = vpop.f32.mrf.mxu2 }
 0x3c1   : > { %2714 = vmatmul.msk.bf16.gmra.mxu3 %vm904_vm0, %v2067_v20  ;;  %v1888_v41 = vadd.f32 %v1887_v44, %v1799_v49 }
 0x3c3   : > { %v1977_v58 = vadd.f32 %v1976_v33, %v1888_v41  ;;  %v3995_v20 = vpop.f32.mrf.mxu3 }
 0x3c4   : > { %v1978_v39 = vpop.f32.mrf.mxu1 }
 0x3c5   : > { %v2041_v55 = vmax.f32 %v1977_v58, 0.0 }
 0x3c8   : > { %v1889_v40 = vpop.f32.mrf.mxu2 }
 0x3c9   : > { %v1890_v17 = vadd.f32 %v1889_v40, %v1801_v28 }
 0x3cb   : > { %v1979_v10 = vadd.f32 %v1978_v39, %v1890_v17  ;;  %v3998_v17 = vpop.f32.mrf.mxu3 }
 0x3cc   : > { %v1981_v42 = vpop.f32.mrf.mxu1 }
 0x3cd   : > { %v2042_v21 = vmax.f32 %v1979_v10, 0.0  ;;  %1931 = vmatmul.bf16.gmra.mxu2 %v1579_v0 }
 0x3cf   : > { %v2068_v61 = vpack.c.bf16 %v2042_v21, %v2041_v55 }
 0x3d0   : > { %v1892_v30 = vpop.f32.mrf.mxu2 }
 0x3d1   : > { %2715 = vmatmul.msk.bf16.gmra.mxu3 %vm904_vm0, %v2068_v61  ;;  %v1893_v62 = vadd.f32 %v1892_v30, %v1804_v63 }
 0x3d3   : > { %v1982_v35 = vadd.f32 %v1981_v42, %v1893_v62  ;;  %v1816_v42 = vadd.f32 %v3916_v59, %v3887_v53  ;;  %v4004_v30 = vpop.f32.mrf.mxu3  ;;  %v4012_v53 = vld [vmem:[%s4154_s6] ss:$0 sm:$0xff] }
 0x3d4   : > { %v1983_v60 = vpop.f32.mrf.mxu1 }
 0x3d5   : > { %v2043_v13 = vmax.f32 %v1982_v35, 0.0 }
 0x3d8   : > { %v1894_v31 = vpop.f32.mrf.mxu2 }
 0x3d9   : > { %v1895_v56 = vadd.f32 %v1894_v31, %v1806_v5 }
 0x3db   : > { %v1984_v4 = vadd.f32 %v1983_v60, %v1895_v56 }
 0x3dc   : > { %v1986_v7 = vpop.f32.mrf.mxu1 }
 0x3dd   : > { %v2044_v48 = vmax.f32 %v1984_v4, 0.0  ;;  %1936 = vmatmul.bf16.gmra.mxu2 %v1582_v9  ;;  %v320_v4 = vld [vmem:[#allocation2 + $0x8] sm:$0xff]  }
 0x3de   : > { %v2084_v52 = vunpack.c.h.bf16 %v320_v4 }
 0x3df   : > { %v2069_v2 = vpack.c.bf16 %v2044_v48, %v2043_v13  ;;  %v2083_v48 = vunpack.c.l.bf16 %v320_v4 }
 0x3e0   : > { %v1897_v33 = vpop.f32.mrf.mxu2 }
 0x3e1   : > { %2716 = vmatmul.msk.bf16.gmra.mxu3 %vm904_vm0, %v2069_v2  ;;  %v1898_v22 = vadd.f32 %v1897_v33, %v1809_v54 }
 0x3e3   : > { %v1987_v12 = vadd.f32 %v1986_v7, %v1898_v22  ;;  %v1821_v7 = vadd.f32 %v3916_v59, %v3896_v32 }
 0x3e4   : > { %v1988_v27 = vpop.f32.mrf.mxu1 }
 0x3e5   : > { %v2045_v41 = vmax.f32 %v1987_v12, 0.0 }
 0x3e8   : > { %v1899_v29 = vpop.f32.mrf.mxu2 }
 0x3e9   : > { %v1900_v44 = vadd.f32 %v1899_v29, %v1811_v38 }
 0x3eb   : > { %v1989_v49 = vadd.f32 %v1988_v27, %v1900_v44 }
 0x3ec   : > { %v1991_v39 = vpop.f32.mrf.mxu1 }
 0x3ed   : > { %v2046_v28 = vmax.f32 %v1989_v49, 0.0 }
 0x3ef   : > { %v2070_v40 = vpack.c.bf16 %v2046_v28, %v2045_v41 }
 0x3f0   : > { %v1902_v58 = vpop.f32.mrf.mxu2 }
 0x3f1   : > { %2717 = vmatmul.msk.bf16.gmra.mxu3 %vm904_vm0, %v2070_v40  ;;  %v1903_v10 = vadd.f32 %v1902_v58, %v1814_v43  ;;  %v1824_v40 = vadd.f32 %v3916_v59, %v3900_v3 }
 0x3f3   : > { %v1992_v55 = vadd.f32 %v1991_v39, %v1903_v10 }
 0x3f4   : > { %v1993_v8 = vpop.f32.mrf.mxu1 }
 0x3f5   : > { %v2047_v63 = vmax.f32 %v1992_v55, 0.0 }
 0x3f8   : > { %v1904_v0 = vpop.f32.mrf.mxu2 }
 0x3f9   : > { %v1905_v21 = vadd.f32 %v1904_v0, %v1816_v42  ;;  %v1826_v42 = vadd.f32 %v3916_v59, %v3907_v51 }
 0x3fb   : > { %v1994_v61 = vadd.f32 %v1993_v8, %v1905_v21  ;;  %v322_v8 = vld [vmem:[#allocation2 + $0x10] sm:$0xff]  }
 0x3fc   : > { %v1996_v5 = vpop.f32.mrf.mxu1  ;;  %v2085_v21 = vunpack.c.l.bf16 %v322_v8 }
 0x3fd   : > { %v2048_v60 = vmax.f32 %v1994_v61, 0.0 }
 0x3ff   : > { %v2071_v62 = vpack.c.bf16 %v2048_v60, %v2047_v63 }
 0x400   : > { %v1907_v31 = vpop.f32.mrf.mxu2 }
 0x401   : > { %2718 = vmatmul.msk.bf16.gmra.mxu3 %vm904_vm0, %v2071_v62  ;;  %v1908_v56 = vadd.f32 %v1907_v31, %v1819_v11  ;;  %v2086_v62 = vunpack.c.h.bf16 %v322_v8  ;;  %v326_v8 = vld [vmem:[#allocation2 + $0x20] sm:$0xff]  }
 0x403   : > { %v1997_v13 = vadd.f32 %v1996_v5, %v1908_v56 }
 0x404   : > { %v2188_v35 = vpop.f32.mrf.mxu3  ;;  %v1998_v54 = vpop.f32.mrf.mxu1 }
 0x405   : > { %v2189_v2 = vadd.f32 %v4012_v53, %v2188_v35  ;;  %v2049_v38 = vmax.f32 %v1997_v13, 0.0 }
 0x407   : > { %v2268_v29 = vadd.f32 %v2189_v2, %v2083_v48  ;;  %v324_v2 = vld [vmem:[#allocation2 + $0x18] sm:$0xff]  }
 0x408   : > { %v1909_v9 = vpop.f32.mrf.mxu2 }
 0x409   : > { %v1910_v33 = vadd.f32 %v1909_v9, %v1821_v7  ;;  %v2300_v32 = vmax.f32 %v2268_v29, 0.0 }
 0x40b   : > { %v1999_v27 = vadd.f32 %v1998_v54, %v1910_v33  ;;  %v1831_v33 = vadd.f32 %v3916_v59, %v3851_v34 }
 0x40c   : > { %v2190_v22 = vpop.f32.mrf.mxu3 }
 0x40d   : > { %v2050_v12 = vmax.f32 %v1999_v27, 0.0  ;;  %v2191_v44 = vadd.f32 %v4012_v53, %v2190_v22 }
 0x40f   : > { %v2072_v49 = vpack.c.bf16 %v2050_v12, %v2049_v38  ;;  %v2269_v39 = vadd.f32 %v2191_v44, %v2084_v52  ;;  %v2087_v52 = vunpack.c.l.bf16 %v324_v2  ;;  %v2088_v12 = vunpack.c.h.bf16 %v324_v2 }
 0x410   : > { %v1912_v41 = vpop.f32.mrf.mxu2 }
 0x411   : > { %v2301_v28 = vmax.f32 %v2269_v39, 0.0  ;;  %2719 = vmatmul.msk.bf16.gmra.mxu3 %vm904_vm0, %v2072_v49  ;;  %v1913_v10 = vadd.f32 %v1912_v41, %v1824_v40 }
 0x413   : > { %v2784_v58 = vpack.c.bf16 %v2301_v28, %v2300_v32  ;;  %v2002_v55 = vadd.f32 %v3932_v45, %v1913_v10  ;;  %v1829_v45 = vadd.f32 %v3916_v59, %v3841_v23 }
 0x414   : > { %v2193_v43 = vpop.f32.mrf.mxu3 }
 0x415   : > { %2785 = vst [vmem:[%s3170_s16] sm:$0xff] %v2784_v58   ;;  %v2194_v61 = vadd.f32 %v4012_v53, %v2193_v43  ;;  %v2051_v5 = vmax.f32 %v2002_v55, 0.0 }
 0x417   : > { %v2270_v31 = vadd.f32 %v2194_v61, %v2085_v21  ;;  %v2089_v21 = vunpack.c.l.bf16 %v326_v8 }
 0x418   : > { %v1914_v0 = vpop.f32.mrf.mxu2 }
 0x419   : > { %v1915_v63 = vadd.f32 %v1914_v0, %v1826_v42  ;;  %v2302_v7 = vmax.f32 %v2270_v31, 0.0  ;;  %v1836_v42 = vadd.f32 %v3916_v59, %v3870_v1 }
 0x41b   : > { %v2004_v60 = vadd.f32 %v3939_v19, %v1915_v63 }
 0x41c   : > { %v2195_v3 = vpop.f32.mrf.mxu3 }
 0x41d   : > { %v2052_v11 = vmax.f32 %v2004_v60, 0.0  ;;  %v2196_v35 = vadd.f32 %v4012_v53, %v2195_v3 }
 0x41f   : > { %v2073_v56 = vpack.c.bf16 %v2052_v11, %v2051_v5  ;;  %v2271_v4 = vadd.f32 %v2196_v35, %v2086_v62  ;;  %v2090_v62 = vunpack.c.h.bf16 %v326_v8 }
 0x420   : > { %v1917_v51 = vpop.f32.mrf.mxu2 }
 0x421   : > { %v2303_v9 = vmax.f32 %v2271_v4, 0.0  ;;  %2720 = vmatmul.msk.bf16.gmra.mxu3 %vm904_vm0, %v2073_v56  ;;  %v1918_v48 = vadd.f32 %v1917_v51, %v1829_v45  ;;  %v328_v45 = vld [vmem:[#allocation2 + $0x28] sm:$0xff]  }
 0x422   : > { %v2091_v2 = vunpack.c.l.bf16 %v328_v45 }
 0x423   : > { %v2789_v13 = vpack.c.bf16 %v2303_v9, %v2302_v7  ;;  %v2007_v27 = vadd.f32 %v3945_v16, %v1918_v48  ;;  %v1834_v16 = vadd.f32 %v3916_v59, %v3856_v15 }
 0x424   : > { %v2198_v19 = vpop.f32.mrf.mxu3 }
 0x425   : > { %2861 = vst [vmem:[%s3170_s16 + $0x8] sm:$0xff] %v2789_v13   ;;  %v2199_v22 = vadd.f32 %v4012_v53, %v2198_v19  ;;  %v2053_v44 = vmax.f32 %v2007_v27, 0.0  ;;  %v1841_v13 = vadd.f32 %v3916_v59, %v3885_v50 }
 0x427   : > { %v2272_v49 = vadd.f32 %v2199_v22, %v2087_v52  ;;  %v2092_v52 = vunpack.c.h.bf16 %v328_v45 }
 0x428   : > { %v1919_v54 = vpop.f32.mrf.mxu2 }
 0x429   : > { %v1920_v38 = vadd.f32 %v1919_v54, %v1831_v33  ;;  %v2304_v40 = vmax.f32 %v2272_v49, 0.0 }
 0x42b   : > { %v2009_v29 = vadd.f32 %v3951_v25, %v1920_v38 }
 0x42c   : > { %v2200_v23 = vpop.f32.mrf.mxu3 }
 0x42d   : > { %v2054_v39 = vmax.f32 %v2009_v29, 0.0  ;;  %v2201_v41 = vadd.f32 %v4012_v53, %v2200_v23 }
 0x42f   : > { %v2074_v32 = vpack.c.bf16 %v2054_v39, %v2053_v44  ;;  %v2273_v28 = vadd.f32 %v2201_v41, %v2088_v12 }
 0x430   : > { %v1922_v34 = vpop.f32.mrf.mxu2 }
 0x431   : > { %v2305_v58 = vmax.f32 %v2273_v28, 0.0  ;;  %2721 = vmatmul.msk.bf16.gmra.mxu3 %vm904_vm0, %v2074_v32  ;;  %v1923_v10 = vadd.f32 %v1922_v34, %v1834_v16  ;;  %v330_v28 = vld [vmem:[#allocation2 + $0x30] sm:$0xff]   ;;  %v1846_v34 = vadd.f32 %v3916_v59, %v3898_v14 }
 0x432   : > { %v2093_v16 = vunpack.c.l.bf16 %v330_v28  ;;  %v2094_v8 = vunpack.c.h.bf16 %v330_v28 }
 0x433   : > { %v2794_v43 = vpack.c.bf16 %v2305_v58, %v2304_v40  ;;  %v2012_v55 = vadd.f32 %v3959_v37, %v1923_v10  ;;  %v1839_v37 = vadd.f32 %v3916_v59, %v3874_v57 }
 0x434   : > { %v2203_v25 = vpop.f32.mrf.mxu3 }
 0x435   : > { %2862 = vst [vmem:[%s3170_s16 + $0x10] sm:$0xff] %v2794_v43   ;;  %v2204_v61 = vadd.f32 %v4012_v53, %v2203_v25  ;;  %v2055_v3 = vmax.f32 %v2012_v55, 0.0 }
 0x437   : > { %v2274_v5 = vadd.f32 %v2204_v61, %v2089_v21 }
 0x438   : > { %v1924_v0 = vpop.f32.mrf.mxu2 }
 0x439   : > { %v1925_v63 = vadd.f32 %v1924_v0, %v1836_v42  ;;  %v2306_v4 = vmax.f32 %v2274_v5, 0.0  ;;  %v332_v5 = vld [vmem:[#allocation2 + $0x38] sm:$0xff]  }
 0x43b   : > { %v2014_v60 = vadd.f32 %v3966_v46, %v1925_v63 }
 0x43c   : > { %v2205_v15 = vpop.f32.mrf.mxu3 }
 0x43d   : > { %v2056_v31 = vmax.f32 %v2014_v60, 0.0  ;;  %v2206_v11 = vadd.f32 %v4012_v53, %v2205_v15 }
 0x43f   : > { %v2075_v35 = vpack.c.bf16 %v2056_v31, %v2055_v3  ;;  %v2275_v56 = vadd.f32 %v2206_v11, %v2090_v62  ;;  %v1851_v31 = vadd.f32 %v3916_v59, %v3909_v36 }
 0x440   : > { %v1927_v1 = vpop.f32.mrf.mxu2 }
 0x441   : > { %v2307_v51 = vmax.f32 %v2275_v56, 0.0  ;;  %2722 = vmatmul.msk.bf16.gmra.mxu3 %vm904_vm0, %v2075_v35  ;;  %v1928_v9 = vadd.f32 %v1927_v1, %v1839_v37  ;;  %v2095_v56 = vunpack.c.l.bf16 %v332_v5  ;;  %v2096_v37 = vunpack.c.h.bf16 %v332_v5 }
 0x443   : > { %v2799_v7 = vpack.c.bf16 %v2307_v51, %v2306_v4  ;;  %v2017_v48 = vadd.f32 %v3973_v6, %v1928_v9  ;;  %v1844_v6 = vadd.f32 %v3916_v59, %v3893_v26 }
 0x444   : > { %v2208_v46 = vpop.f32.mrf.mxu3 }
 0x445   : > { %2863 = vst [vmem:[%s3170_s16 + $0x18] sm:$0xff] %v2799_v7   ;;  %v2209_v33 = vadd.f32 %v4012_v53, %v2208_v46  ;;  %v2057_v22 = vmax.f32 %v2017_v48, 0.0 }
 0x447   : > { %v2276_v38 = vadd.f32 %v2209_v33, %v2091_v2  ;;  %v334_v2 = vld [vmem:[#allocation2 + $0x40] sm:$0xff]  }
 0x448   : > { %v1929_v19 = vpop.f32.mrf.mxu2  ;;  %v2097_v33 = vunpack.c.l.bf16 %v334_v2 }
 0x449   : > { %v1930_v54 = vadd.f32 %v1929_v19, %v1841_v13  ;;  %v2308_v49 = vmax.f32 %v2276_v38, 0.0 }
 0x44b   : > { %v2019_v27 = vadd.f32 %v3981_v24, %v1930_v54  ;;  %v2098_v54 = vunpack.c.h.bf16 %v334_v2 }
 0x44c   : > { %v2210_v57 = vpop.f32.mrf.mxu3 }
 0x44d   : > { %v2058_v29 = vmax.f32 %v2019_v27, 0.0  ;;  %v2211_v12 = vadd.f32 %v4012_v53, %v2210_v57 }
 0x44f   : > { %v2076_v23 = vpack.c.bf16 %v2058_v29, %v2057_v22  ;;  %v2277_v44 = vadd.f32 %v2211_v12, %v2092_v52 }
 0x450   : > { %v1932_v50 = vpop.f32.mrf.mxu2 }
 0x451   : > { %v2309_v39 = vmax.f32 %v2277_v44, 0.0  ;;  %2723 = vmatmul.msk.bf16.gmra.mxu3 %vm904_vm0, %v2076_v23  ;;  %v1933_v32 = vadd.f32 %v1932_v50, %v1844_v6  ;;  %v336_v44 = vld [vmem:[#allocation2 + $0x48] sm:$0xff]  }
 0x452   : > { %v2099_v50 = vunpack.c.l.bf16 %v336_v44 }
 0x453   : > { %v2804_v41 = vpack.c.bf16 %v2309_v39, %v2308_v49  ;;  %v2022_v58 = vadd.f32 %v3988_v18, %v1933_v32  ;;  %v1849_v18 = vadd.f32 %v3916_v59, %v3905_v47  ;;  %v2100_v39 = vunpack.c.h.bf16 %v336_v44 }
 0x454   : > { %v2213_v24 = vpop.f32.mrf.mxu3 }
 0x455   : > { %2864 = vst [vmem:[%s3170_s16 + $0x20] sm:$0xff] %v2804_v41   ;;  %v2214_v43 = vadd.f32 %v4012_v53, %v2213_v24  ;;  %v2059_v42 = vmax.f32 %v2022_v58, 0.0 }
 0x457   : > { %v2278_v0 = vadd.f32 %v2214_v43, %v2093_v16  ;;  %v338_v16 = vld [vmem:[#allocation2 + $0x50] sm:$0xff]  }
 0x458   : > { %v1934_v40 = vpop.f32.mrf.mxu2  ;;  %v2101_v43 = vunpack.c.l.bf16 %v338_v16 }
 0x459   : > { %v1935_v25 = vadd.f32 %v1934_v40, %v1846_v34  ;;  %v2310_v60 = vmax.f32 %v2278_v0, 0.0 }
 0x45b   : > { %v2024_v10 = vadd.f32 %v3995_v20, %v1935_v25 }
 0x45c   : > { %v2215_v26 = vpop.f32.mrf.mxu3 }
 0x45d   : > { %v2060_v55 = vmax.f32 %v2024_v10, 0.0  ;;  %v2216_v21 = vadd.f32 %v4012_v53, %v2215_v26  ;;  %v2102_v10 = vunpack.c.h.bf16 %v338_v16 }
 0x45f   : > { %v2077_v61 = vpack.c.bf16 %v2060_v55, %v2059_v42  ;;  %v2279_v63 = vadd.f32 %v2216_v21, %v2094_v8 }
 0x460   : > { %v1937_v14 = vpop.f32.mrf.mxu2 }
 0x461   : > { %v2311_v62 = vmax.f32 %v2279_v63, 0.0  ;;  %2724 = vmatmul.msk.bf16.gmra.mxu3 %vm904_vm0, %v2077_v61  ;;  %v1938_v3 = vadd.f32 %v1937_v14, %v1849_v18  ;;  %v340_v14 = vld [vmem:[#allocation2 + $0x58] sm:$0xff]  }
 0x462   : > { %v2104_v18 = vunpack.c.h.bf16 %v340_v14 }
 0x463   : > { %v2809_v15 = vpack.c.bf16 %v2311_v62, %v2310_v60  ;;  %v2027_v35 = vadd.f32 %v3998_v17, %v1938_v3  ;;  %v2103_v60 = vunpack.c.l.bf16 %v340_v14 }
 0x464   : > { %v2218_v20 = vpop.f32.mrf.mxu3 }
 0x465   : > { %2865 = vst [vmem:[%s3170_s16 + $0x28] sm:$0xff] %v2809_v15   ;;  %v2219_v1 = vadd.f32 %v4012_v53, %v2218_v20  ;;  %v2061_v7 = vmax.f32 %v2027_v35, 0.0 }
 0x467   : > { %v2280_v46 = vadd.f32 %v2219_v1, %v2095_v56  ;;  %v342_v1 = vld [vmem:[#allocation2 + $0x60] sm:$0xff]  }
 0x468   : > { %v1939_v11 = vpop.f32.mrf.mxu2 }
 0x469   : > { %v1940_v4 = vadd.f32 %v1939_v11, %v1851_v31  ;;  %v2312_v36 = vmax.f32 %v2280_v46, 0.0 }
 0x46b   : > { %v2029_v51 = vadd.f32 %v4004_v30, %v1940_v4  ;;  %v2105_v4 = vunpack.c.l.bf16 %v342_v1 }
 0x46c   : > { %v2220_v47 = vpop.f32.mrf.mxu3 }
 0x46d   : > { %v2062_v9 = vmax.f32 %v2029_v51, 0.0  ;;  %v2221_v45 = vadd.f32 %v4012_v53, %v2220_v47 }
 0x46f   : > { %v2078_v13 = vpack.c.bf16 %v2062_v9, %v2061_v7  ;;  %v2281_v19 = vadd.f32 %v2221_v45, %v2096_v37  ;;  %v2106_v37 = vunpack.c.h.bf16 %v342_v1 }
 0x471   : > { %v2313_v59 = vmax.f32 %v2281_v19, 0.0  ;;  %2725 = vmatmul.msk.bf16.gmra.mxu3 %vm904_vm0, %v2078_v13 }
 0x473   : > { %v2814_v17 = vpack.c.bf16 %v2313_v59, %v2312_v36  ;;  %v344_v59 = vld [vmem:[#allocation2 + $0x68] sm:$0xff]  }
 0x474   : > { %v2223_v48 = vpop.f32.mrf.mxu3  ;;  %v2108_v2 = vunpack.c.h.bf16 %v344_v59 }
 0x475   : > { %2866 = vst [vmem:[%s3170_s16 + $0x30] sm:$0xff] %v2814_v17   ;;  %v2224_v30 = vadd.f32 %v4012_v53, %v2223_v48  ;;  %v2107_v17 = vunpack.c.l.bf16 %v344_v59 }
 0x477   : > { %v2282_v52 = vadd.f32 %v2224_v30, %v2097_v33 }
 0x479   : > { %v2314_v38 = vmax.f32 %v2282_v52, 0.0 }
 0x47c   : > { %v2225_v27 = vpop.f32.mrf.mxu3 }
 0x47d   : > { %v2226_v57 = vadd.f32 %v4012_v53, %v2225_v27 }
 0x47f   : > { %v2283_v22 = vadd.f32 %v2226_v57, %v2098_v54 }
 0x481   : > { %v2315_v29 = vmax.f32 %v2283_v22, 0.0 }
 0x483   : > { %v2819_v12 = vpack.c.bf16 %v2315_v29, %v2314_v38  ;;  %v346_v29 = vld [vmem:[#allocation2 + $0x70] sm:$0xff]  }
 0x484   : > { %v2228_v23 = vpop.f32.mrf.mxu3  ;;  %v2110_v44 = vunpack.c.h.bf16 %v346_v29 }
 0x485   : > { %2867 = vst [vmem:[%s3170_s16 + $0x38] sm:$0xff] %v2819_v12   ;;  %v2229_v49 = vadd.f32 %v4012_v53, %v2228_v23  ;;  %v2109_v12 = vunpack.c.l.bf16 %v346_v29 }
 0x487   : > { %v2284_v41 = vadd.f32 %v2229_v49, %v2099_v50 }
 0x489   : > { %v2316_v28 = vmax.f32 %v2284_v41, 0.0 }
 0x48c   : > { %v2230_v6 = vpop.f32.mrf.mxu3 }
 0x48d   : > { %v2231_v24 = vadd.f32 %v4012_v53, %v2230_v6 }
 0x48f   : > { %v2285_v32 = vadd.f32 %v2231_v24, %v2100_v39 }
 0x491   : > { %v2317_v34 = vmax.f32 %v2285_v32, 0.0 }
 0x493   : > { %v2824_v40 = vpack.c.bf16 %v2317_v34, %v2316_v28  ;;  %v348_v34 = vld [vmem:[#allocation2 + $0x78] sm:$0xff]  }
 0x494   : > { %v2233_v58 = vpop.f32.mrf.mxu3  ;;  %v2112_v16 = vunpack.c.h.bf16 %v348_v34 }
 0x495   : > { %2868 = vst [vmem:[%s3170_s16 + $0x40] sm:$0xff] %v2824_v40   ;;  %v2234_v25 = vadd.f32 %v4012_v53, %v2233_v58  ;;  %v2111_v40 = vunpack.c.l.bf16 %v348_v34 }
 0x497   : > { %v2286_v26 = vadd.f32 %v2234_v25, %v2101_v43 }
 0x499   : > { %v2318_v55 = vmax.f32 %v2286_v26, 0.0 }
 0x49c   : > { %v2235_v8 = vpop.f32.mrf.mxu3 }
 0x49d   : > { %v2236_v42 = vadd.f32 %v4012_v53, %v2235_v8 }
 0x49f   : > { %v2287_v0 = vadd.f32 %v2236_v42, %v2102_v10 }
 0x4a1   : > { %v2319_v21 = vmax.f32 %v2287_v0, 0.0 }
 0x4a3   : > { %v2829_v61 = vpack.c.bf16 %v2319_v21, %v2318_v55  ;;  %v350_v21 = vld [vmem:[#allocation2 + $0x80] sm:$0xff]  }
 0x4a4   : > { %v2238_v63 = vpop.f32.mrf.mxu3  ;;  %v2114_v14 = vunpack.c.h.bf16 %v350_v21 }
 0x4a5   : > { %2869 = vst [vmem:[%s3170_s16 + $0x48] sm:$0xff] %v2829_v61   ;;  %v2239_v62 = vadd.f32 %v4012_v53, %v2238_v63  ;;  %v2113_v61 = vunpack.c.l.bf16 %v350_v21 }
 0x4a7   : > { %v2288_v20 = vadd.f32 %v2239_v62, %v2103_v60 }
 0x4a9   : > { %v2320_v31 = vmax.f32 %v2288_v20, 0.0 }
 0x4ac   : > { %v2240_v15 = vpop.f32.mrf.mxu3 }
 0x4ad   : > { %v2241_v3 = vadd.f32 %v4012_v53, %v2240_v15 }
 0x4af   : > { %v2289_v5 = vadd.f32 %v2241_v3, %v2104_v18 }
 0x4b1   : > { %v2321_v11 = vmax.f32 %v2289_v5, 0.0 }
 0x4b3   : > { %v2834_v35 = vpack.c.bf16 %v2321_v11, %v2320_v31 }
 0x4b4   : > { %v2243_v56 = vpop.f32.mrf.mxu3 }
 0x4b5   : > { %2870 = vst [vmem:[%s3170_s16 + $0x50] sm:$0xff] %v2834_v35   ;;  %v2244_v51 = vadd.f32 %v4012_v53, %v2243_v56 }
 0x4b7   : > { %v2290_v7 = vadd.f32 %v2244_v51, %v2105_v4 }
 0x4b9   : > { %v2322_v45 = vmax.f32 %v2290_v7, 0.0 }
 0x4bc   : > { %v2245_v47 = vpop.f32.mrf.mxu3 }
 0x4bd   : > { %v2246_v46 = vadd.f32 %v4012_v53, %v2245_v47 }
 0x4bf   : > { %v2291_v9 = vadd.f32 %v2246_v46, %v2106_v37 }
 0x4c1   : > { %v2323_v13 = vmax.f32 %v2291_v9, 0.0 }
 0x4c3   : > { %v2839_v19 = vpack.c.bf16 %v2323_v13, %v2322_v45 }
 0x4c4   : > { %v2248_v36 = vpop.f32.mrf.mxu3 }
 0x4c5   : > { %2871 = vst [vmem:[%s3170_s16 + $0x58] sm:$0xff] %v2839_v19   ;;  %v2249_v48 = vadd.f32 %v4012_v53, %v2248_v36 }
 0x4c7   : > { %v2292_v30 = vadd.f32 %v2249_v48, %v2107_v17 }
 0x4c9   : > { %v2324_v52 = vmax.f32 %v2292_v30, 0.0 }
 0x4cc   : > { %v2250_v33 = vpop.f32.mrf.mxu3 }
 0x4cd   : > { %v2251_v54 = vadd.f32 %v4012_v53, %v2250_v33 }
 0x4cf   : > { %v2293_v27 = vadd.f32 %v2251_v54, %v2108_v2 }
 0x4d1   : > { %v2325_v57 = vmax.f32 %v2293_v27, 0.0 }
 0x4d3   : > { %v2844_v22 = vpack.c.bf16 %v2325_v57, %v2324_v52 }
 0x4d4   : > { %v2253_v38 = vpop.f32.mrf.mxu3 }
 0x4d5   : > { %2872 = vst [vmem:[%s3170_s16 + $0x60] sm:$0xff] %v2844_v22   ;;  %v2254_v23 = vadd.f32 %v4012_v53, %v2253_v38 }
 0x4d7   : > { %v2294_v49 = vadd.f32 %v2254_v23, %v2109_v12 }
 0x4d9   : > { %v2326_v41 = vmax.f32 %v2294_v49, 0.0 }
 0x4dc   : > { %v2255_v50 = vpop.f32.mrf.mxu3 }
 0x4dd   : > { %v2256_v39 = vadd.f32 %v4012_v53, %v2255_v50 }
 0x4df   : > { %v2295_v6 = vadd.f32 %v2256_v39, %v2110_v44 }
 0x4e1   : > { %v2327_v24 = vmax.f32 %v2295_v6, 0.0 }
 0x4e3   : > { %v2849_v32 = vpack.c.bf16 %v2327_v24, %v2326_v41 }
 0x4e4   : > { %v2258_v28 = vpop.f32.mrf.mxu3 }
 0x4e5   : > { %2873 = vst [vmem:[%s3170_s16 + $0x68] sm:$0xff] %v2849_v32   ;;  %v2259_v58 = vadd.f32 %v4012_v53, %v2258_v28 }
 0x4e7   : > { %v2296_v25 = vadd.f32 %v2259_v58, %v2111_v40 }
 0x4e9   : > { %v2328_v26 = vmax.f32 %v2296_v25, 0.0 }
 0x4ec   : > { %v2260_v43 = vpop.f32.mrf.mxu3 }
 0x4ed   : > { %v2261_v10 = vadd.f32 %v4012_v53, %v2260_v43 }
 0x4ef   : > { %v2297_v8 = vadd.f32 %v2261_v10, %v2112_v16 }
 0x4f1   : > { %v2329_v42 = vmax.f32 %v2297_v8, 0.0 }
 0x4f3   : > { %v2854_v0 = vpack.c.bf16 %v2329_v42, %v2328_v26 }
 0x4f4   : > { %v2263_v55 = vpop.f32.mrf.mxu3 }
 0x4f5   : > { %2874 = vst [vmem:[%s3170_s16 + $0x70] sm:$0xff] %v2854_v0   ;;  %v2264_v63 = vadd.f32 %v4012_v53, %v2263_v55 }
 0x4f7   : > { %v2298_v62 = vadd.f32 %v2264_v63, %v2113_v61 }
 0x4f9   : > { %v2330_v20 = vmax.f32 %v2298_v62, 0.0 }
 0x4fc   : > { %v2265_v60 = vpop.f32.mrf.mxu3 }
 0x4fd   : > { %v2266_v18 = vadd.f32 %v4012_v53, %v2265_v60 }
 0x4ff   : > { %v2299_v15 = vadd.f32 %v2266_v18, %v2114_v14 }
 0x501   : > { %v2331_v3 = vmax.f32 %v2299_v15, 0.0 }
 0x503   : > { %v2859_v5 = vpack.c.bf16 %v2331_v3, %v2330_v20 }
 0x505   : > { %2875 = vst [vmem:[%s3170_s16 + $0x78] sm:$0xff] %v2859_v5  }
 0x506   : > { %3001 = shalt.err (!%p2998_p10)
}
 0x507   : > { %s3061_s15 = smov 4  }
 0x508   : > { %2886 = dma.vmem_to_hbm [thread:$0]  (%p3142_p4), %s2413_s20, 2048, %s2415_s22, %s2397_s27, %s3059_s9, %s3059_s9, %s3061_s15  }
 0x509 PF: > { %p2892_p11 = scmp.ge.s32.totalorder %s3054_s29, 2  ;;  %s2429_s16 = sand.u32 1, %s3034_s24  }
 0x50a   : > { %s2430_s14 = scalar_lea.sflag [#allocation5], %s2429_s16 }
 0x50b   : > { %p2889_p12 = pnand %p2892_p11, %p3149_p8 }
 0x50d   : > { %p2890_p13 = pneg %p2889_p12 }
 0x50f   : > { %3029 = dma.done.wait (%p2890_p13), %s2430_s14, 2048  }
 0x510   : > { %3031 = vsyncadd (%p2890_p13), %s2430_s14, 4294965248  ;;  %s20_s29 = sadd.s32 1, %s3054_s29   ;;  %s4165_s11 = sld [smem:[#allocation16_spill]] }
 0x511   : > { %p17_p0 = scmp.ge.s32.totalorder %s20_s29, 4   ;;  %s4166_s27 = sld [smem:[#allocation14_spill]] }
 0x512   : > { %s4167_s28 = sld [smem:[#allocation15_spill]]  ;;  %s4168_s24 = smov %s3038_s25 }
 0x513   : > { %s4169_s25 = smov %s3042_s26  ;;  %19 = sbr.rel (!%p17_p0) target bundleno = 4 (0x4), region = 99 }
 0x516   : > { %s4170_s26 = smov %s4165_s11 }
 0x518   :  { %2436 = vsyncpa [#allocation5], 1 }
 0x519   :  { %2438 = vsyncpa [#allocation5 + $0x1], 1 }
 0x51a   :  { %2439 = vsyncmov [#allocation3] }
 0x51d   :  { %s2440_s13 = vpop.sfrf %2439 }
 0x51e   :  { %p2731_p4 = scmp.ne.s32.totalorder %s2440_s13, 0 }
 0x520   :  { %2444 = shalt.err (%p2731_p4)  }
 0x521   :  { %2446 = vsyncmov [#allocation3 + $0x1] }
 0x524   :  { %s2447_s9 = vpop.sfrf %2446 }
 0x525   :  { %p2732_p8 = scmp.ne.s32.totalorder %s2447_s9, 0 }
 0x527   :  { %2451 = shalt.err (%p2732_p8)  }

</bundles_post_ra>
